<compile_context>
chip_gen: v7x
topology: tpu7x:2x2x1
jax: 0.10.0
libtpu: 0.0.40
codegen_flags: <defaults>
</compile_context>

<pallas_src>
import functools

import jax
import jax.numpy as jnp
from jax import lax
from jax.experimental import pallas as pl
from jax.experimental.pallas import tpu as pltpu


def _adaptive_fm_kernel(x_ref, w_ref, b_ref, o_ref, xpad_ref, *, H, W, K):
    # x_ref    : (NB, H, W, C)            input block (channels on lanes)
    # w_ref    : (K, K, C)                depthwise weights
    # b_ref    : (1, 1, C)                bias
    # o_ref    : (NB, H, W, C)            output block
    # xpad_ref : (NB, H+2p, W+2p, C) f32  zero-padded scratch (VMEM)
    p = (K - 1) // 2

    xv = x_ref[...].astype(jnp.float32)                   # (NB, H, W, C)

    # Build the zero-padded planes in VMEM (borders zero, interior = x).
    xpad_ref[...] = jnp.zeros_like(xpad_ref)
    xpad_ref[:, p:p + H, p:p + W, :] = xv

    w = w_ref[...].astype(jnp.float32)                    # (K, K, C)
    b = b_ref[...].astype(jnp.float32)                    # (1, 1, C)
    C = w.shape[-1]

    acc = jnp.zeros_like(xv)
    # K is small & static -> fully unrolled at trace time.  Each tap is a
    # shifted window of the padded scratch scaled by a per-channel (per-lane)
    # weight: pure VPU work, no cross-lane movement.
    for ki in range(K):
        for kj in range(K):
            wk = w[ki, kj, :].reshape(1, 1, 1, C)
            acc = acc + wk * xpad_ref[:, ki:ki + H, kj:kj + W, :]

    # Residual reuses the already-loaded tile (no second HBM read of x).
    o_ref[...] = (acc + b + xv).astype(o_ref.dtype)


def _round_up(v, m):
    return (v + m - 1) // m * m


def _pick_batch_block(N, H, W, C, K, itemsize,
                      vmem_budget_bytes=24 * 1024 * 1024):
    """Largest batch block (divisor of N) whose VMEM footprint fits the budget."""
    p = (K - 1) // 2
    c_lanes = _round_up(C, 128)                                   # lane padding
    io_bytes = 2 * H * _round_up(W, 8) * c_lanes * itemsize       # in + out blocks
    pad_bytes = (H + 2 * p) * _round_up(W + 2 * p, 8) * c_lanes * 4  # f32 scratch
    per_image = 2 * io_bytes + pad_bytes                          # x2: double buffering
    nb = max(1, int(vmem_budget_bytes // max(per_image, 1)))
    nb = min(nb, N)
    if N >= 2:
        nb = min(nb, max(1, N // 2))      # keep >=2 grid steps so DMA overlaps
    while N % nb:                         # keep grid math exact (no ragged tail)
        nb -= 1
    return nb


def adaptive_fm(x, weight, bias, kernel_size):
    """AdaptiveFM forward.  x: (N, C, H, W); weight: (C, 1, K, K); bias: (C,)."""
    N, C, H, W = x.shape
    K = kernel_size
    if K % 2 != 1:
        raise ValueError(
            "AdaptiveFM requires an odd kernel_size: with even K and "
            "padding=(K-1)//2 the conv output shape would not match x.")
    p = (K - 1) // 2

    # Channels-last re-layout (layout plumbing only; elide if model is NHWC).
    x_nhwc = jnp.transpose(x, (0, 2, 3, 1))                       # (N, H, W, C)
    w_kkc = jnp.transpose(weight.reshape(C, K, K), (1, 2, 0))     # (K, K, C)
    b_11c = bias.reshape(1, 1, C)

    NB = _pick_batch_block(N, H, W, C, K, x.dtype.itemsize)
    grid = (N // NB,)

    kernel = functools.partial(_adaptive_fm_kernel, H=H, W=W, K=K)

    out_nhwc = pl.pallas_call(
        kernel,
        out_shape=jax.ShapeDtypeStruct((N, H, W, C), x.dtype),
        grid=grid,
        in_specs=[
            pl.BlockSpec((NB, H, W, C), lambda i: (i, 0, 0, 0)),
            pl.BlockSpec((K, K, C), lambda i: (0, 0, 0)),   # fetched once, reused
            pl.BlockSpec((1, 1, C), lambda i: (0, 0, 0)),   # fetched once, reused
        ],
        out_specs=pl.BlockSpec((NB, H, W, C), lambda i: (i, 0, 0, 0)),
        scratch_shapes=[
            pltpu.VMEM((NB, H + 2 * p, W + 2 * p, C), jnp.float32),
        ],
        compiler_params=pltpu.CompilerParams(
            dimension_semantics=("parallel",),
            vmem_limit_bytes=48 * 1024 * 1024,
        ),
    )(x_nhwc, w_kkc, b_11c)

    return jnp.transpose(out_nhwc, (0, 3, 1, 2))                  # back to NCHW


if __name__ == "__main__":
    N, C, H, W = 2, 4, 16, 16
    K = 3

    key = jax.random.PRNGKey(0)
    kx, kw, kb = jax.random.split(key, 3)
    x = jax.random.normal(kx, (N, C, H, W), dtype=jnp.float32)
    # Conv2d(C, C, K, groups=C): weight (C, 1, K, K), bias (C,)
    weight = jax.random.normal(kw, (C, 1, K, K), dtype=jnp.float32) * 0.1
    bias = jax.random.normal(kb, (C,), dtype=jnp.float32) * 0.1

    out = adaptive_fm(x, weight, bias, K)
    out = jax.block_until_ready(out)

    # Reference: XLA grouped (depthwise) conv + bias + residual.
    p = (K - 1) // 2
    ref = lax.conv_general_dilated(
        x, weight, window_strides=(1, 1), padding=((p, p), (p, p)),
        dimension_numbers=("NCHW", "OIHW", "NCHW"), feature_group_count=C,
    ) + bias[None, :, None, None] + x

    assert out.shape == (N, C, H, W)
    assert jnp.allclose(out, ref, atol=1e-4, rtol=1e-4), "mismatch vs reference"

    print("KERNEL_OK")
</pallas_src>

<mosaic_0001>
module attributes {stable_mosaic.version = 11 : i64} {
  func.func @_adaptive_fm_kernel(%arg0: i32, %arg1: memref<1x16x16x4xf32, #tpu.memory_space<vmem>>, %arg2: memref<3x3x4xf32, #tpu.memory_space<vmem>>, %arg3: memref<1x1x4xf32, #tpu.memory_space<vmem>>, %arg4: memref<1x16x16x4xf32, #tpu.memory_space<vmem>>, %arg5: memref<1x18x18x4xf32, #tpu.memory_space<vmem>>) attributes {dimension_semantics = [#tpu.dimension_semantics<parallel>], iteration_bounds = array<i64: 2>, scalar_prefetch = 0 : i64, scratch_operands = 1 : i64, tpu.core_type = #tpu.core_type<tc>, window_params = [{transform_indices = @transform_0, window_bounds = array<i64: 1, 16, 16, 4>}, {pipeline_mode = #tpu.pipeline_mode<synchronous>, transform_indices = @transform_1, window_bounds = array<i64: 3, 3, 4>}, {pipeline_mode = #tpu.pipeline_mode<synchronous>, transform_indices = @transform_2, window_bounds = array<i64: 1, 1, 4>}, {transform_indices = @transform_3, window_bounds = array<i64: 1, 16, 16, 4>}]} {
    %c0 = arith.constant 0 : index
    %c0_0 = arith.constant 0 : index
    %c0_1 = arith.constant 0 : index
    %c0_2 = arith.constant 0 : index
    %0 = vector.load %arg1[%c0, %c0_0, %c0_1, %c0_2] : memref<1x16x16x4xf32, #tpu.memory_space<vmem>>, vector<1x16x16x4xf32>
    %cst = arith.constant 0.000000e+00 : f32
    %1 = vector.broadcast %cst : f32 to vector<1x18x18x4xf32>
    %c0_3 = arith.constant 0 : index
    %c0_4 = arith.constant 0 : index
    %c0_5 = arith.constant 0 : index
    %c0_6 = arith.constant 0 : index
    %2 = vector.load %arg5[%c0_3, %c0_4, %c0_5, %c0_6] : memref<1x18x18x4xf32, #tpu.memory_space<vmem>>, vector<1x18x18x4xf32>
    tpu.vector_store %arg5[%c0_3, %c0_4, %c0_5, %c0_6], %1 {strides = array<i32>} : memref<1x18x18x4xf32, #tpu.memory_space<vmem>>, vector<1x18x18x4xf32>,
    %c0_7 = arith.constant 0 : index
    %c1 = arith.constant 1 : index
    %c1_8 = arith.constant 1 : index
    %c0_9 = arith.constant 0 : index
    %3 = vector.load %arg5[%c0_7, %c1, %c1_8, %c0_9] : memref<1x18x18x4xf32, #tpu.memory_space<vmem>>, vector<1x16x16x4xf32>
    tpu.vector_store %arg5[%c0_7, %c1, %c1_8, %c0_9], %0 {strides = array<i32>} : memref<1x18x18x4xf32, #tpu.memory_space<vmem>>, vector<1x16x16x4xf32>,
    %c0_10 = arith.constant 0 : index
    %c0_11 = arith.constant 0 : index
    %c0_12 = arith.constant 0 : index
    %4 = vector.load %arg2[%c0_10, %c0_11, %c0_12] : memref<3x3x4xf32, #tpu.memory_space<vmem>>, vector<3x3x4xf32>
    %c0_13 = arith.constant 0 : index
    %c0_14 = arith.constant 0 : index
    %c0_15 = arith.constant 0 : index
    %5 = vector.load %arg3[%c0_13, %c0_14, %c0_15] : memref<1x1x4xf32, #tpu.memory_space<vmem>>, vector<1x1x4xf32>
    %cst_16 = arith.constant 0.000000e+00 : f32
    %6 = vector.broadcast %cst_16 : f32 to vector<1x16x16x4xf32>
    %7 = vector.extract_strided_slice %4 {offsets = [0, 0, 0], sizes = [1, 1, 4], strides = [1, 1, 1]} : vector<3x3x4xf32> to vector<1x1x4xf32>
    %8 = vector.shape_cast %7 : vector<1x1x4xf32> to vector<4xf32>
    %9 = vector.shape_cast %8 : vector<4xf32> to vector<1x1x1x4xf32>
    %c0_17 = arith.constant 0 : index
    %c0_18 = arith.constant 0 : index
    %c0_19 = arith.constant 0 : index
    %c0_20 = arith.constant 0 : index
    %10 = vector.load %arg5[%c0_17, %c0_18, %c0_19, %c0_20] : memref<1x18x18x4xf32, #tpu.memory_space<vmem>>, vector<1x16x16x4xf32>
    %11 = vector.broadcast %9 : vector<1x1x1x4xf32> to vector<1x16x16x4xf32>
    %12 = arith.mulf %11, %10 : vector<1x16x16x4xf32>
    %13 = arith.addf %6, %12 : vector<1x16x16x4xf32>
    %14 = vector.extract_strided_slice %4 {offsets = [0, 1, 0], sizes = [1, 1, 4], strides = [1, 1, 1]} : vector<3x3x4xf32> to vector<1x1x4xf32>
    %15 = vector.shape_cast %14 : vector<1x1x4xf32> to vector<4xf32>
    %16 = vector.shape_cast %15 : vector<4xf32> to vector<1x1x1x4xf32>
    %c0_21 = arith.constant 0 : index
    %c0_22 = arith.constant 0 : index
    %c1_23 = arith.constant 1 : index
    %c0_24 = arith.constant 0 : index
    %17 = vector.load %arg5[%c0_21, %c0_22, %c1_23, %c0_24] : memref<1x18x18x4xf32, #tpu.memory_space<vmem>>, vector<1x16x16x4xf32>
    %18 = vector.broadcast %16 : vector<1x1x1x4xf32> to vector<1x16x16x4xf32>
    %19 = arith.mulf %18, %17 : vector<1x16x16x4xf32>
    %20 = arith.addf %13, %19 : vector<1x16x16x4xf32>
    %21 = vector.extract_strided_slice %4 {offsets = [0, 2, 0], sizes = [1, 1, 4], strides = [1, 1, 1]} : vector<3x3x4xf32> to vector<1x1x4xf32>
    %22 = vector.shape_cast %21 : vector<1x1x4xf32> to vector<4xf32>
    %23 = vector.shape_cast %22 : vector<4xf32> to vector<1x1x1x4xf32>
    %c0_25 = arith.constant 0 : index
    %c0_26 = arith.constant 0 : index
    %c2 = arith.constant 2 : index
    %c0_27 = arith.constant 0 : index
    %24 = vector.load %arg5[%c0_25, %c0_26, %c2, %c0_27] : memref<1x18x18x4xf32, #tpu.memory_space<vmem>>, vector<1x16x16x4xf32>
    %25 = vector.broadcast %23 : vector<1x1x1x4xf32> to vector<1x16x16x4xf32>
    %26 = arith.mulf %25, %24 : vector<1x16x16x4xf32>
    %27 = arith.addf %20, %26 : vector<1x16x16x4xf32>
    %28 = vector.extract_strided_slice %4 {offsets = [1, 0, 0], sizes = [1, 1, 4], strides = [1, 1, 1]} : vector<3x3x4xf32> to vector<1x1x4xf32>
    %29 = vector.shape_cast %28 : vector<1x1x4xf32> to vector<4xf32>
    %30 = vector.shape_cast %29 : vector<4xf32> to vector<1x1x1x4xf32>
    %c0_28 = arith.constant 0 : index
    %c1_29 = arith.constant 1 : index
    %c0_30 = arith.constant 0 : index
    %c0_31 = arith.constant 0 : index
    %31 = vector.load %arg5[%c0_28, %c1_29, %c0_30, %c0_31] : memref<1x18x18x4xf32, #tpu.memory_space<vmem>>, vector<1x16x16x4xf32>
    %32 = vector.broadcast %30 : vector<1x1x1x4xf32> to vector<1x16x16x4xf32>
    %33 = arith.mulf %32, %31 : vector<1x16x16x4xf32>
    %34 = arith.addf %27, %33 : vector<1x16x16x4xf32>
    %35 = vector.extract_strided_slice %4 {offsets = [1, 1, 0], sizes = [1, 1, 4], strides = [1, 1, 1]} : vector<3x3x4xf32> to vector<1x1x4xf32>
    %36 = vector.shape_cast %35 : vector<1x1x4xf32> to vector<4xf32>
    %37 = vector.shape_cast %36 : vector<4xf32> to vector<1x1x1x4xf32>
    %c0_32 = arith.constant 0 : index
    %c1_33 = arith.constant 1 : index
    %c1_34 = arith.constant 1 : index
    %c0_35 = arith.constant 0 : index
    %38 = vector.load %arg5[%c0_32, %c1_33, %c1_34, %c0_35] : memref<1x18x18x4xf32, #tpu.memory_space<vmem>>, vector<1x16x16x4xf32>
    %39 = vector.broadcast %37 : vector<1x1x1x4xf32> to vector<1x16x16x4xf32>
    %40 = arith.mulf %39, %38 : vector<1x16x16x4xf32>
    %41 = arith.addf %34, %40 : vector<1x16x16x4xf32>
    %42 = vector.extract_strided_slice %4 {offsets = [1, 2, 0], sizes = [1, 1, 4], strides = [1, 1, 1]} : vector<3x3x4xf32> to vector<1x1x4xf32>
    %43 = vector.shape_cast %42 : vector<1x1x4xf32> to vector<4xf32>
    %44 = vector.shape_cast %43 : vector<4xf32> to vector<1x1x1x4xf32>
    %c0_36 = arith.constant 0 : index
    %c1_37 = arith.constant 1 : index
    %c2_38 = arith.constant 2 : index
    %c0_39 = arith.constant 0 : index
    %45 = vector.load %arg5[%c0_36, %c1_37, %c2_38, %c0_39] : memref<1x18x18x4xf32, #tpu.memory_space<vmem>>, vector<1x16x16x4xf32>
    %46 = vector.broadcast %44 : vector<1x1x1x4xf32> to vector<1x16x16x4xf32>
    %47 = arith.mulf %46, %45 : vector<1x16x16x4xf32>
    %48 = arith.addf %41, %47 : vector<1x16x16x4xf32>
    %49 = vector.extract_strided_slice %4 {offsets = [2, 0, 0], sizes = [1, 1, 4], strides = [1, 1, 1]} : vector<3x3x4xf32> to vector<1x1x4xf32>
    %50 = vector.shape_cast %49 : vector<1x1x4xf32> to vector<4xf32>
    %51 = vector.shape_cast %50 : vector<4xf32> to vector<1x1x1x4xf32>
    %c0_40 = arith.constant 0 : index
    %c2_41 = arith.constant 2 : index
    %c0_42 = arith.constant 0 : index
    %c0_43 = arith.constant 0 : index
    %52 = vector.load %arg5[%c0_40, %c2_41, %c0_42, %c0_43] : memref<1x18x18x4xf32, #tpu.memory_space<vmem>>, vector<1x16x16x4xf32>
    %53 = vector.broadcast %51 : vector<1x1x1x4xf32> to vector<1x16x16x4xf32>
    %54 = arith.mulf %53, %52 : vector<1x16x16x4xf32>
    %55 = arith.addf %48, %54 : vector<1x16x16x4xf32>
    %56 = vector.extract_strided_slice %4 {offsets = [2, 1, 0], sizes = [1, 1, 4], strides = [1, 1, 1]} : vector<3x3x4xf32> to vector<1x1x4xf32>
    %57 = vector.shape_cast %56 : vector<1x1x4xf32> to vector<4xf32>
    %58 = vector.shape_cast %57 : vector<4xf32> to vector<1x1x1x4xf32>
    %c0_44 = arith.constant 0 : index
    %c2_45 = arith.constant 2 : index
    %c1_46 = arith.constant 1 : index
    %c0_47 = arith.constant 0 : index
    %59 = vector.load %arg5[%c0_44, %c2_45, %c1_46, %c0_47] : memref<1x18x18x4xf32, #tpu.memory_space<vmem>>, vector<1x16x16x4xf32>
    %60 = vector.broadcast %58 : vector<1x1x1x4xf32> to vector<1x16x16x4xf32>
    %61 = arith.mulf %60, %59 : vector<1x16x16x4xf32>
    %62 = arith.addf %55, %61 : vector<1x16x16x4xf32>
    %63 = vector.extract_strided_slice %4 {offsets = [2, 2, 0], sizes = [1, 1, 4], strides = [1, 1, 1]} : vector<3x3x4xf32> to vector<1x1x4xf32>
    %64 = vector.shape_cast %63 : vector<1x1x4xf32> to vector<4xf32>
    %65 = vector.shape_cast %64 : vector<4xf32> to vector<1x1x1x4xf32>
    %c0_48 = arith.constant 0 : index
    %c2_49 = arith.constant 2 : index
    %c2_50 = arith.constant 2 : index
    %c0_51 = arith.constant 0 : index
    %66 = vector.load %arg5[%c0_48, %c2_49, %c2_50, %c0_51] : memref<1x18x18x4xf32, #tpu.memory_space<vmem>>, vector<1x16x16x4xf32>
    %67 = vector.broadcast %65 : vector<1x1x1x4xf32> to vector<1x16x16x4xf32>
    %68 = arith.mulf %67, %66 : vector<1x16x16x4xf32>
    %69 = arith.addf %62, %68 : vector<1x16x16x4xf32>
    %70 = vector.shape_cast %5 : vector<1x1x4xf32> to vector<1x1x1x4xf32>
    %71 = vector.broadcast %70 : vector<1x1x1x4xf32> to vector<1x16x16x4xf32>
    %72 = arith.addf %69, %71 : vector<1x16x16x4xf32>
    %73 = arith.addf %72, %0 : vector<1x16x16x4xf32>
    %c0_52 = arith.constant 0 : index
    %c0_53 = arith.constant 0 : index
    %c0_54 = arith.constant 0 : index
    %c0_55 = arith.constant 0 : index
    %74 = vector.load %arg4[%c0_52, %c0_53, %c0_54, %c0_55] : memref<1x16x16x4xf32, #tpu.memory_space<vmem>>, vector<1x16x16x4xf32>
    tpu.vector_store %arg4[%c0_52, %c0_53, %c0_54, %c0_55], %73 {strides = array<i32>} : memref<1x16x16x4xf32, #tpu.memory_space<vmem>>, vector<1x16x16x4xf32>,
    return
  }
  func.func @transform_0(%arg0: i32) -> (i32, i32, i32, i32) {
    %c0_i32 = arith.constant 0 : i32
    %c0_i32_0 = arith.constant 0 : i32
    %c0_i32_1 = arith.constant 0 : i32
    %c0_i32_2 = arith.constant 0 : i32
    return %arg0, %c0_i32, %c0_i32_0, %c0_i32_1 : i32, i32, i32, i32
  }
  func.func @transform_1(%arg0: i32) -> (i32, i32, i32) {
    %c0_i32 = arith.constant 0 : i32
    %c0_i32_0 = arith.constant 0 : i32
    %c0_i32_1 = arith.constant 0 : i32
    %c0_i32_2 = arith.constant 0 : i32
    return %c0_i32, %c0_i32_0, %c0_i32_1 : i32, i32, i32
  }
  func.func @transform_2(%arg0: i32) -> (i32, i32, i32) {
    %c0_i32 = arith.constant 0 : i32
    %c0_i32_0 = arith.constant 0 : i32
    %c0_i32_1 = arith.constant 0 : i32
    %c0_i32_2 = arith.constant 0 : i32
    return %c0_i32, %c0_i32_0, %c0_i32_1 : i32, i32, i32
  }
  func.func @transform_3(%arg0: i32) -> (i32, i32, i32, i32) {
    %c0_i32 = arith.constant 0 : i32
    %c0_i32_0 = arith.constant 0 : i32
    %c0_i32_1 = arith.constant 0 : i32
    %c0_i32_2 = arith.constant 0 : i32
    return %arg0, %c0_i32, %c0_i32_0, %c0_i32_1 : i32, i32, i32, i32
  }
}

</mosaic_0001>

<bundles_post_ra>
// kernel: tpu_custom_call.1
= control target key start
LH: loop header
LB: loop body
LE: loop exit
PB: predicated region body
PF: predicated region fallthrough
CT: control target
= control target key end

     0   :  { %s1407_s12 = smov 0   ;;  %s2362_s0 = inlined_call_operand.vmem [shape: f32[2,16,16,4], index: 0, kind: input, shape index: {}]   ;;  %s2363_s1 = inlined_call_operand.vmem [shape: f32[3,3,4], index: 1, kind: input, shape index: {}]   ;;  %s2364_s2 = inlined_call_operand.vmem [shape: f32[1,1,4], index: 2, kind: input, shape index: {}]   ;;  %s2365_s3 = inlined_call_operand.vmem [shape: f32[2,16,16,4], index: 3, kind: output, shape index: {}]  }
   0x1 LB: > { %s1354_s13 = sadd.s32 4294967295, %s1384_s12   ;;  %p1358_p0 = scmp.ge.s32.totalorder %s1384_s12, 1  ;;  %s1384_s12 = sphi %s1407_s12, %s13_s12  }
   0x2   : > { %p137_p1 = scmp.lt.s32.totalorder %s1384_s12, 3 }
   0x4   : > { %p138_p2 = pnand %p1358_p0, %p137_p1 }
   0x6   : > { %141 = sbr.rel (%p138_p2) target bundleno = 220 (0xdc), region = 32 }
   0xd   : > { %vm203_vm0 = vcmask 31744   ;;  %vm206_vm1 = vcmask 25600   ;;  %p1417_p3 = scmp.lt.s32.totalorder %s1354_s13, 1  ;;  %v1386_v0 = vmov 0.0   ;;  %v328_v1 = vlaneseq  ;;  %v292_v12 = vld [vmem:[%s2363_s1] sm:$0x7] }
   0xe   : > { %204 = vst.msk [vmem:[#allocation2] sm:$0xff] %vm203_vm0, %v1386_v0  ;;  %205 = vst.msk [vmem:[#allocation2 + $0x8] sm:$0xff] %vm203_vm0, %v1386_v0  ;;  %v293_v25 = vld [vmem:[%s2363_s1 + $0x4] sm:$0x7]  ;;  %v294_v32 = vld [vmem:[%s2363_s1 + $0x8] sm:$0x7] }
   0xf   : > { %208 = vst.msk [vmem:[#allocation2 + $0x18] sm:$0xff] %vm203_vm0, %v1386_v0  ;;  %209 = vst.msk [vmem:[#allocation2 + $0x20] sm:$0xff] %vm203_vm0, %v1386_v0  ;;  %s2410_s13 = smov (!%p1417_p3, %s1354_s13), 1  ;;  %v329_v2 = vshrl.u32 %v328_v1, 7 }
  0x10   : > { %211 = vst.msk [vmem:[#allocation2 + $0x30] sm:$0xff] %vm203_vm0, %v1386_v0  ;;  %212 = vst.msk [vmem:[#allocation2 + $0x38] sm:$0xff] %vm203_vm0, %v1386_v0  ;;  %s1366_s15 = sshll.u32 %s2410_s13, 8 }
  0x11   : > { %214 = vst.msk [vmem:[#allocation2 + $0x48] sm:$0xff] %vm203_vm0, %v1386_v0  ;;  %215 = vst.msk [vmem:[#allocation2 + $0x50] sm:$0xff] %vm203_vm0, %v1386_v0  ;;  %s1487_s18 = scalar_lea.vmem %s2362_s0, %s1366_s15  ;;  %v1546_v16 = vsub.s32 0, %v329_v2  ;;  %v430_v20 = vsub.s32 1, %v329_v2  ;;  %v1563_v21 = vsub.s32 2, %v329_v2  ;;  %s1768_s29 = scalar_lea.vmem %s2365_s3, %s1366_s15 }
  0x12   : > { %217 = vst.msk [vmem:[#allocation2 + $0x60] sm:$0xff] %vm203_vm0, %v1386_v0  ;;  %218 = vst.msk [vmem:[#allocation2 + $0x68] sm:$0xff] %vm203_vm0, %v1386_v0  ;;  %v1490_v3 = vld [vmem:[%s1487_s18] sm:$0xff]  ;;  %v1493_v4 = vld [vmem:[%s1487_s18 + $0x8] sm:$0xff] }
  0x13   : > { %220 = vst.msk [vmem:[#allocation2 + $0x78] sm:$0xff] %vm203_vm0, %v1386_v0  ;;  %221 = vst.msk [vmem:[#allocation2 + $0x80] sm:$0xff] %vm203_vm0, %v1386_v0  ;;  %v1496_v5 = vld [vmem:[%s1487_s18 + $0x10] sm:$0xff]  ;;  %v1505_v6 = vld [vmem:[%s1487_s18 + $0x18] sm:$0xff]  ;;  %v1617_v33 = vrot.slane %v292_v12, %v1546_v16  ;;  %v1634_v37 = vrot.slane %v292_v12, %v430_v20  ;;  %v1637_v38 = vrot.slane %v292_v12, %v1563_v21 }
  0x14   : > { %223 = vst.msk [vmem:[#allocation2 + $0x90] sm:$0xff] %vm203_vm0, %v1386_v0  ;;  %224 = vst.msk [vmem:[#allocation2 + $0x98] sm:$0xff] %vm203_vm0, %v1386_v0  ;;  %v1508_v7 = vld [vmem:[%s1487_s18 + $0x20] sm:$0xff]  ;;  %v1511_v8 = vld [vmem:[%s1487_s18 + $0x28] sm:$0xff]  ;;  %v1667_v45 = vrot.slane %v293_v25, %v1546_v16  ;;  %v1674_v50 = vrot.slane %v293_v25, %v430_v20  ;;  %v1677_v51 = vrot.slane %v293_v25, %v1563_v21 }
  0x15   : > { %226 = vst.msk [vmem:[#allocation2 + $0xa8] sm:$0xff] %vm203_vm0, %v1386_v0  ;;  %227 = vst.msk [vmem:[#allocation2 + $0xb0] sm:$0xff] %vm203_vm0, %v1386_v0  ;;  %v1520_v9 = vld [vmem:[%s1487_s18 + $0x30] sm:$0xff]  ;;  %v1523_v10 = vld [vmem:[%s1487_s18 + $0x38] sm:$0xff]  ;;  %v1682_v56 = vrot.slane %v294_v32, %v1546_v16  ;;  %v1687_v60 = vrot.slane %v294_v32, %v430_v20  ;;  %v1692_v1 = vrot.slane %v294_v32, %v1563_v21 }
  0x16   : > { %229 = vst.msk [vmem:[#allocation2 + $0xc0] sm:$0xff] %vm203_vm0, %v1386_v0  ;;  %230 = vst.msk [vmem:[#allocation2 + $0xc8] sm:$0xff] %vm203_vm0, %v1386_v0  ;;  %v1526_v11 = vld [vmem:[%s1487_s18 + $0x40] sm:$0xff]  ;;  %v1538_v13 = vld [vmem:[%s1487_s18 + $0x48] sm:$0xff] }
  0x17   : > { %232 = vst.msk [vmem:[#allocation2 + $0xd8] sm:$0xff] %vm203_vm0, %v1386_v0  ;;  %233 = vst.msk [vmem:[#allocation2 + $0xe0] sm:$0xff] %vm203_vm0, %v1386_v0  ;;  %v1541_v14 = vld [vmem:[%s1487_s18 + $0x50] sm:$0xff]  ;;  %v1544_v15 = vld [vmem:[%s1487_s18 + $0x58] sm:$0xff] }
  0x18   : > { %235 = vst.msk [vmem:[#allocation2 + $0xf0] sm:$0xff] %vm203_vm0, %v1386_v0  ;;  %236 = vst.msk [vmem:[#allocation2 + $0xf8] sm:$0xff] %vm203_vm0, %v1386_v0  ;;  %v1555_v17 = vld [vmem:[%s1487_s18 + $0x60] sm:$0xff]  ;;  %v1558_v18 = vld [vmem:[%s1487_s18 + $0x68] sm:$0xff] }
  0x19   : > { %238 = vst.msk [vmem:[#allocation2 + $0x108] sm:$0xff] %vm203_vm0, %v1386_v0  ;;  %239 = vst.msk [vmem:[#allocation2 + $0x110] sm:$0xff] %vm203_vm0, %v1386_v0  ;;  %v1561_v19 = vld [vmem:[%s1487_s18 + $0x70] sm:$0xff]  ;;  %v1572_v22 = vld [vmem:[%s1487_s18 + $0x78] sm:$0xff] }
  0x1a   : > { %241 = vst.msk [vmem:[#allocation2 + $0x120] sm:$0xff] %vm203_vm0, %v1386_v0  ;;  %242 = vst.msk [vmem:[#allocation2 + $0x128] sm:$0xff] %vm203_vm0, %v1386_v0  ;;  %v1575_v23 = vld [vmem:[%s1487_s18 + $0x80] sm:$0xff]  ;;  %v1578_v24 = vld [vmem:[%s1487_s18 + $0x88] sm:$0xff] }
  0x1b   : > { %244 = vst.msk [vmem:[#allocation2 + $0x138] sm:$0xff] %vm203_vm0, %v1386_v0  ;;  %245 = vst.msk [vmem:[#allocation2 + $0x140] sm:$0xff] %vm203_vm0, %v1386_v0  ;;  %v1590_v26 = vld [vmem:[%s1487_s18 + $0x90] sm:$0xff]  ;;  %v1593_v27 = vld [vmem:[%s1487_s18 + $0x98] sm:$0xff] }
  0x1c   : > { %247 = vst.msk [vmem:[#allocation2 + $0x150] sm:$0xff] %vm203_vm0, %v1386_v0  ;;  %248 = vst.msk [vmem:[#allocation2 + $0x158] sm:$0xff] %vm203_vm0, %v1386_v0  ;;  %v1596_v28 = vld [vmem:[%s1487_s18 + $0xa0] sm:$0xff]  ;;  %v1605_v29 = vld [vmem:[%s1487_s18 + $0xa8] sm:$0xff] }
  0x1d   : > { %250 = vst.msk [vmem:[#allocation2 + $0x168] sm:$0xff] %vm203_vm0, %v1386_v0  ;;  %251 = vst.msk [vmem:[#allocation2 + $0x170] sm:$0xff] %vm203_vm0, %v1386_v0  ;;  %v1608_v30 = vld [vmem:[%s1487_s18 + $0xb0] sm:$0xff]  ;;  %v1611_v31 = vld [vmem:[%s1487_s18 + $0xb8] sm:$0xff] }
  0x1e   : > { %253 = vst.msk [vmem:[#allocation2 + $0x180] sm:$0xff] %vm203_vm0, %v1386_v0  ;;  %254 = vst.msk [vmem:[#allocation2 + $0x188] sm:$0xff] %vm203_vm0, %v1386_v0  ;;  %v1626_v34 = vld [vmem:[%s1487_s18 + $0xc0] sm:$0xff]  ;;  %v1629_v35 = vld [vmem:[%s1487_s18 + $0xc8] sm:$0xff] }
  0x1f   : > { %256 = vst.msk [vmem:[#allocation2 + $0x198] sm:$0xff] %vm203_vm0, %v1386_v0  ;;  %257 = vst.msk [vmem:[#allocation2 + $0x1a0] sm:$0xff] %vm203_vm0, %v1386_v0  ;;  %v1632_v36 = vld [vmem:[%s1487_s18 + $0xd0] sm:$0xff]  ;;  %v1646_v39 = vld [vmem:[%s1487_s18 + $0xd8] sm:$0xff] }
  0x20   : > { %207 = vst.msk [vmem:[#allocation2 + $0x10] sm:$0x3] %vm206_vm1, %v1386_v0  ;;  %210 = vst.msk [vmem:[#allocation2 + $0x28] sm:$0x3] %vm206_vm1, %v1386_v0  ;;  %v1649_v40 = vld [vmem:[%s1487_s18 + $0xe0] sm:$0xff]  ;;  %v1652_v41 = vld [vmem:[%s1487_s18 + $0xe8] sm:$0xff] }
  0x21   : > { %213 = vst.msk [vmem:[#allocation2 + $0x40] sm:$0x3] %vm206_vm1, %v1386_v0  ;;  %216 = vst.msk [vmem:[#allocation2 + $0x58] sm:$0x3] %vm206_vm1, %v1386_v0  ;;  %v1661_v42 = vld [vmem:[%s1487_s18 + $0xf0] sm:$0xff]  ;;  %v1664_v43 = vld [vmem:[%s1487_s18 + $0xf8] sm:$0xff] }
  0x22   : > { %219 = vst.msk [vmem:[#allocation2 + $0x70] sm:$0x3] %vm206_vm1, %v1386_v0  ;;  %222 = vst.msk [vmem:[#allocation2 + $0x88] sm:$0x3] %vm206_vm1, %v1386_v0  ;;  %v296_v44 = vld [vmem:[#allocation2] sm:$0xff]  ;;  %v297_v61 = vld [vmem:[#allocation2 + $0x8] sm:$0xff] }
  0x23   : > { %225 = vst.msk [vmem:[#allocation2 + $0xa0] sm:$0x3] %vm206_vm1, %v1386_v0  ;;  %228 = vst.msk [vmem:[#allocation2 + $0xb8] sm:$0x3] %vm206_vm1, %v1386_v0  ;;  %v332_v46 = vmul.f32 %v1617_v33, %v296_v44  ;;  %v396_v47 = vld [vmem:[#allocation2 + $0x1] sm:$0xff]  ;;  %v333_v2 = vmul.f32 %v1617_v33, %v297_v61 }
  0x24   : > { %231 = vst.msk [vmem:[#allocation2 + $0xd0] sm:$0x3] %vm206_vm1, %v1386_v0  ;;  %234 = vst.msk [vmem:[#allocation2 + $0xe8] sm:$0x3] %vm206_vm1, %v1386_v0  ;;  %v496_v48 = vld [vmem:[#allocation2 + $0x2] sm:$0xff]  ;;  %v432_v52 = vmul.f32 %v1634_v37, %v396_v47 }
  0x25   : > { %237 = vst.msk [vmem:[#allocation2 + $0x100] sm:$0x3] %vm206_vm1, %v1386_v0  ;;  %240 = vst.msk [vmem:[#allocation2 + $0x118] sm:$0x3] %vm206_vm1, %v1386_v0  ;;  %v532_v53 = vmul.f32 %v1637_v38, %v496_v48 }
  0x26   : > { %243 = vst.msk [vmem:[#allocation2 + $0x130] sm:$0x3] %vm206_vm1, %v1386_v0  ;;  %246 = vst.msk [vmem:[#allocation2 + $0x148] sm:$0x3] %vm206_vm1, %v1386_v0  ;;  %v464_v63 = vadd.f32 %v432_v52, %v332_v46 }
  0x27   : > { %249 = vst.msk [vmem:[#allocation2 + $0x160] sm:$0x3] %vm206_vm1, %v1386_v0  ;;  %252 = vst.msk [vmem:[#allocation2 + $0x178] sm:$0x3] %vm206_vm1, %v1386_v0  ;;  %v397_v12 = vld [vmem:[#allocation2 + $0x9] sm:$0xff] }
  0x28   : > { %255 = vst.msk [vmem:[#allocation2 + $0x190] sm:$0x3] %vm206_vm1, %v1386_v0  ;;  %258 = vst.msk [vmem:[#allocation2 + $0x1a8] sm:$0x3] %vm206_vm1, %v1386_v0  ;;  %v497_v16 = vld [vmem:[#allocation2 + $0xa] sm:$0xff]  ;;  %v433_v47 = vmul.f32 %v1634_v37, %v397_v12 }
  0x29   : > { %260 = vst.msk [vmem:[#allocation2 + $0x19] sm:$0xff] %vm203_vm0, %v1490_v3  ;;  %261 = vst.msk [vmem:[#allocation2 + $0x21] sm:$0xff] %vm203_vm0, %v1493_v4  ;;  %v533_v20 = vmul.f32 %v1637_v38, %v497_v16 }
  0x2a   : > { %262 = vst.msk [vmem:[#allocation2 + $0x31] sm:$0xff] %vm203_vm0, %v1496_v5  ;;  %263 = vst.msk [vmem:[#allocation2 + $0x39] sm:$0xff] %vm203_vm0, %v1505_v6  ;;  %v465_v61 = vadd.f32 %v433_v47, %v333_v2 }
  0x2b   : > { %264 = vst.msk [vmem:[#allocation2 + $0x49] sm:$0xff] %vm203_vm0, %v1508_v7  ;;  %265 = vst.msk [vmem:[#allocation2 + $0x51] sm:$0xff] %vm203_vm0, %v1511_v8 }
  0x2c   : > { %266 = vst.msk [vmem:[#allocation2 + $0x61] sm:$0xff] %vm203_vm0, %v1520_v9  ;;  %267 = vst.msk [vmem:[#allocation2 + $0x69] sm:$0xff] %vm203_vm0, %v1523_v10 }
  0x2d   : > { %268 = vst.msk [vmem:[#allocation2 + $0x79] sm:$0xff] %vm203_vm0, %v1526_v11  ;;  %269 = vst.msk [vmem:[#allocation2 + $0x81] sm:$0xff] %vm203_vm0, %v1538_v13 }
  0x2e   : > { %270 = vst.msk [vmem:[#allocation2 + $0x91] sm:$0xff] %vm203_vm0, %v1541_v14  ;;  %271 = vst.msk [vmem:[#allocation2 + $0x99] sm:$0xff] %vm203_vm0, %v1544_v15 }
  0x2f   : > { %272 = vst.msk [vmem:[#allocation2 + $0xa9] sm:$0xff] %vm203_vm0, %v1555_v17  ;;  %273 = vst.msk [vmem:[#allocation2 + $0xb1] sm:$0xff] %vm203_vm0, %v1558_v18 }
  0x30   : > { %274 = vst.msk [vmem:[#allocation2 + $0xc1] sm:$0xff] %vm203_vm0, %v1561_v19  ;;  %275 = vst.msk [vmem:[#allocation2 + $0xc9] sm:$0xff] %vm203_vm0, %v1572_v22  ;;  %v596_v49 = vld [vmem:[#allocation2 + $0x18] sm:$0xff]  ;;  %v597_v25 = vld [vmem:[#allocation2 + $0x20] sm:$0xff] }
  0x31   : > { %276 = vst.msk [vmem:[#allocation2 + $0xd9] sm:$0xff] %vm203_vm0, %v1575_v23  ;;  %277 = vst.msk [vmem:[#allocation2 + $0xe1] sm:$0xff] %vm203_vm0, %v1578_v24  ;;  %v696_v54 = vld [vmem:[#allocation2 + $0x19] sm:$0xff]  ;;  %v334_v57 = vmul.f32 %v596_v49, %v1617_v33  ;;  %v897_v58 = vld [vmem:[#allocation2 + $0x30] sm:$0xff]  ;;  %v632_v0 = vmul.f32 %v1667_v45, %v596_v49  ;;  %v633_v12 = vmul.f32 %v1667_v45, %v597_v25 }
  0x32   : > { %2381 = vst [vmem:[#allocation3_spill] sm:$0xff] %v1590_v26  ;;  %2382 = vst [vmem:[#allocation4_spill] sm:$0xff] %v1593_v27  ;;  %v796_v55 = vld [vmem:[#allocation2 + $0x1a] sm:$0xff]  ;;  %v1685_v59 = vld [vmem:[#allocation2 + $0x31] sm:$0xff]  ;;  %v434_v62 = vmul.f32 %v696_v54, %v1634_v37  ;;  %v732_v46 = vmul.f32 %v1674_v50, %v696_v54  ;;  %v933_v21 = vmul.f32 %v1682_v56, %v897_v58 }
  0x33   : > { %2383 = vst [vmem:[#allocation5_spill] sm:$0xff] %v1596_v28  ;;  %278 = vst.msk [vmem:[#allocation2 + $0xf1] sm:$0xff] %vm203_vm0, %v1590_v26  ;;  %v1097_v44 = vld [vmem:[#allocation2 + $0x32] sm:$0xff]  ;;  %v697_v48 = vld [vmem:[#allocation2 + $0x21] sm:$0xff]  ;;  %v832_v49 = vmul.f32 %v1677_v51, %v796_v55  ;;  %v1033_v52 = vmul.f32 %v1687_v60, %v1685_v59  ;;  %v534_v16 = vmul.f32 %v796_v55, %v1637_v38 }
  0x34   : > { %279 = vst.msk [vmem:[#allocation2 + $0xf9] sm:$0xff] %vm203_vm0, %v1593_v27  ;;  %280 = vst.msk [vmem:[#allocation2 + $0x109] sm:$0xff] %vm203_vm0, %v1596_v28  ;;  %v1700_v32 = vld [vmem:[#allocation2 + $0x38] sm:$0xff]  ;;  %v733_v54 = vmul.f32 %v1674_v50, %v697_v48  ;;  %v634_v2 = vmul.f32 %v897_v58, %v1667_v45  ;;  %v1715_v55 = vld [vmem:[#allocation2 + $0x48] sm:$0xff] }
  0x35   : > { %2384 = vst [vmem:[#allocation6_spill] sm:$0xff] %v1605_v29  ;;  %2385 = vst [vmem:[#allocation7_spill] sm:$0xff] %v1608_v30 }
  0x36   : > { %2386 = vst [vmem:[#allocation8_spill] sm:$0xff] %v1611_v31  ;;  %281 = vst.msk [vmem:[#allocation2 + $0x111] sm:$0xff] %vm203_vm0, %v1605_v29 }
  0x37   : > { %282 = vst.msk [vmem:[#allocation2 + $0x121] sm:$0xff] %vm203_vm0, %v1608_v30  ;;  %283 = vst.msk [vmem:[#allocation2 + $0x129] sm:$0xff] %vm203_vm0, %v1611_v31  ;;  %v435_v31 = vmul.f32 %v697_v48, %v1634_v37  ;;  %v935_v48 = vmul.f32 %v1682_v56, %v1715_v55 }
  0x38   : > { %2387 = vst [vmem:[#allocation9_spill] sm:$0xff] %v1626_v34  ;;  %2388 = vst [vmem:[#allocation10_spill] sm:$0xff] %v1629_v35 }
  0x39   : > { %2389 = vst [vmem:[#allocation11_spill] sm:$0xff] %v1632_v36  ;;  %284 = vst.msk [vmem:[#allocation2 + $0x139] sm:$0xff] %vm203_vm0, %v1626_v34 }
  0x3a   : > { %285 = vst.msk [vmem:[#allocation2 + $0x141] sm:$0xff] %vm203_vm0, %v1629_v35  ;;  %286 = vst.msk [vmem:[#allocation2 + $0x151] sm:$0xff] %vm203_vm0, %v1632_v36  ;;  %v934_v36 = vmul.f32 %v1682_v56, %v1700_v32 }
  0x3b   : > { %2390 = vst [vmem:[#allocation12_spill] sm:$0xff] %v1646_v39  ;;  %2391 = vst [vmem:[#allocation13_spill] sm:$0xff] %v1649_v40 }
  0x3c   : > { %2392 = vst [vmem:[#allocation14_spill] sm:$0xff] %v1652_v41  ;;  %287 = vst.msk [vmem:[#allocation2 + $0x159] sm:$0xff] %vm203_vm0, %v1646_v39 }
  0x3d   : > { %288 = vst.msk [vmem:[#allocation2 + $0x169] sm:$0xff] %vm203_vm0, %v1649_v40  ;;  %289 = vst.msk [vmem:[#allocation2 + $0x171] sm:$0xff] %vm203_vm0, %v1652_v41  ;;  %v564_v41 = vadd.f32 %v532_v53, %v464_v63  ;;  %v998_v40 = vld [vmem:[#allocation2 + $0x39] sm:$0xff]  ;;  %v1133_v53 = vmul.f32 %v1692_v1, %v1097_v44  ;;  %v565_v63 = vadd.f32 %v533_v20, %v465_v61 }
  0x3e   : > { %2393 = vst [vmem:[#allocation15_spill] sm:$0xff] %v1661_v42  ;;  %2394 = vst [vmem:[#allocation16_spill] sm:$0xff] %v1664_v43  ;;  %v1034_v34 = vmul.f32 %v1687_v60, %v998_v40 }
  0x3f   : > { %290 = vst.msk [vmem:[#allocation2 + $0x181] sm:$0xff] %vm203_vm0, %v1661_v42  ;;  %291 = vst.msk [vmem:[#allocation2 + $0x189] sm:$0xff] %vm203_vm0, %v1664_v43  ;;  %v797_v43 = vld [vmem:[#allocation2 + $0x22] sm:$0xff]  ;;  %v466_v42 = vadd.f32 %v434_v62, %v334_v57  ;;  %v664_v39 = vadd.f32 %v632_v0, %v564_v41  ;;  %v1709_v62 = vld [vmem:[#allocation2 + $0x3a] sm:$0xff]  ;;  %v335_v0 = vmul.f32 %v597_v25, %v1617_v33 }
  0x40   : > { %v833_v57 = vmul.f32 %v1677_v51, %v797_v43  ;;  %v1717_v41 = vld [vmem:[#allocation2 + $0x49] sm:$0xff]  ;;  %v665_v30 = vadd.f32 %v633_v12, %v565_v63  ;;  %v1134_v20 = vmul.f32 %v1692_v1, %v1709_v62  ;;  %v535_v28 = vmul.f32 %v797_v43, %v1637_v38  ;;  %v1740_v43 = vld [vmem:[#allocation2 + $0x51] sm:$0xff] }
  0x41   : > { %v566_v35 = vadd.f32 %v534_v16, %v466_v42  ;;  %v764_v47 = vadd.f32 %v732_v46, %v664_v39  ;;  %v734_v42 = vmul.f32 %v1685_v59, %v1674_v50  ;;  %v834_v39 = vmul.f32 %v1097_v44, %v1677_v51  ;;  %v1726_v46 = vld [vmem:[#allocation2 + $0x4a] sm:$0xff] }
  0x42   : > { %v467_v29 = vadd.f32 %v435_v31, %v335_v0  ;;  %v765_v27 = vadd.f32 %v733_v54, %v665_v30  ;;  %v1035_v12 = vmul.f32 %v1687_v60, %v1717_v41  ;;  %v1135_v31 = vmul.f32 %v1692_v1, %v1726_v46  ;;  %v1738_v30 = vld [vmem:[#allocation2 + $0x50] sm:$0xff] }
  0x43   : > { %v666_v61 = vadd.f32 %v634_v2, %v566_v35  ;;  %v864_v16 = vadd.f32 %v832_v49, %v764_v47  ;;  %v635_v49 = vmul.f32 %v1700_v32, %v1667_v45  ;;  %v336_v2 = vmul.f32 %v897_v58, %v1617_v33 }
  0x44   : > { %v567_v63 = vadd.f32 %v535_v28, %v467_v29  ;;  %v865_v47 = vadd.f32 %v833_v57, %v765_v27  ;;  %v436_v54 = vmul.f32 %v1685_v59, %v1634_v37  ;;  %v735_v28 = vmul.f32 %v998_v40, %v1674_v50  ;;  %v1750_v27 = vld [vmem:[%s2364_s2] ss:$0 sm:$0xff] }
  0x45   : > { %v766_v25 = vadd.f32 %v734_v42, %v666_v61  ;;  %v965_v35 = vadd.f32 %v933_v21, %v864_v16  ;;  %v835_v29 = vmul.f32 %v1709_v62, %v1677_v51  ;;  %v536_v42 = vmul.f32 %v1097_v44, %v1637_v38 }
  0x46   : > { %v667_v21 = vadd.f32 %v635_v49, %v567_v63  ;;  %v966_v58 = vadd.f32 %v934_v36, %v865_v47  ;;  %v468_v61 = vadd.f32 %v436_v54, %v336_v2  ;;  %v636_v49 = vmul.f32 %v1715_v55, %v1667_v45 }
  0x47   : > { %v866_v26 = vadd.f32 %v834_v39, %v766_v25  ;;  %v1065_v0 = vadd.f32 %v1033_v52, %v965_v35  ;;  %v936_v52 = vmul.f32 %v1682_v56, %v1738_v30  ;;  %v1036_v39 = vmul.f32 %v1687_v60, %v1740_v43 }
  0x48   : > { %v767_v59 = vadd.f32 %v735_v28, %v667_v21  ;;  %v1066_v25 = vadd.f32 %v1034_v34, %v966_v58  ;;  %v568_v63 = vadd.f32 %v536_v42, %v468_v61  ;;  %v337_v44 = vmul.f32 %v1700_v32, %v1617_v33  ;;  %v901_v32 = vld [vmem:[#allocation2 + $0x60] sm:$0xff] }
  0x49   : > { %v967_v57 = vadd.f32 %v935_v48, %v866_v26  ;;  %v1165_v16 = vadd.f32 %v1133_v53, %v1065_v0  ;;  %v437_v53 = vmul.f32 %v998_v40, %v1634_v37  ;;  %v736_v47 = vmul.f32 %v1717_v41, %v1674_v50 }
  0x4a   : > { %v867_v26 = vadd.f32 %v835_v29, %v767_v59  ;;  %v1166_v34 = vadd.f32 %v1134_v20, %v1066_v25  ;;  %v668_v2 = vadd.f32 %v636_v49, %v568_v63  ;;  %v537_v40 = vmul.f32 %v1709_v62, %v1637_v38  ;;  %v1101_v25 = vld [vmem:[#allocation2 + $0x62] sm:$0xff] }
  0x4b   : > { %v1067_v35 = vadd.f32 %v1035_v12, %v967_v57  ;;  %v1203_v36 = vadd.f32 %v1750_v27, %v1165_v16  ;;  %v1100_v12 = vld [vmem:[#allocation2 + $0x52] sm:$0xff]  ;;  %v469_v21 = vadd.f32 %v437_v53, %v337_v44  ;;  %v836_v20 = vmul.f32 %v1726_v46, %v1677_v51  ;;  %v1001_v57 = vld [vmem:[#allocation2 + $0x61] sm:$0xff] }
  0x4c   : > { %v968_v0 = vadd.f32 %v936_v52, %v867_v26  ;;  %v1204_v28 = vadd.f32 %v1750_v27, %v1166_v34  ;;  %v768_v58 = vadd.f32 %v736_v47, %v668_v2  ;;  %v637_v62 = vmul.f32 %v1738_v30, %v1667_v45  ;;  %v1789_v49 = vld [vmem:[#allocation2 + $0x68] sm:$0xff] }
  0x4d   : > { %v1167_v48 = vadd.f32 %v1135_v31, %v1067_v35  ;;  %v1235_v54 = vadd.f32 %v1203_v36, %v1490_v3  ;;  %v1136_v3 = vmul.f32 %v1692_v1, %v1100_v12  ;;  %v569_v61 = vadd.f32 %v537_v40, %v469_v21  ;;  %v1798_v26 = vld [vmem:[#allocation2 + $0x69] sm:$0xff] }
  0x4e   : > { %v1068_v31 = vadd.f32 %v1036_v39, %v968_v0  ;;  %v1236_v42 = vadd.f32 %v1204_v28, %v1493_v4  ;;  %v868_v59 = vadd.f32 %v836_v20, %v768_v58  ;;  %v937_v52 = vmul.f32 %v1682_v56, %v901_v32 }
  0x4f   : > { %v1205_v29 = vadd.f32 %v1750_v27, %v1167_v48  ;;  %1267 = vst.msk [vmem:[%s1768_s29] sm:$0xff] %vm203_vm0, %v1235_v54  ;;  %v669_v63 = vadd.f32 %v637_v62, %v569_v61  ;;  %v737_v39 = vmul.f32 %v1740_v43, %v1674_v50  ;;  %v338_v36 = vmul.f32 %v1715_v55, %v1617_v33  ;;  %v1807_v54 = vld [vmem:[#allocation2 + $0x6a] sm:$0xff] }
  0x50   : > { %v1168_v35 = vadd.f32 %v1136_v3, %v1068_v31  ;;  %1268 = vst.msk [vmem:[%s1768_s29 + $0x8] sm:$0xff] %vm203_vm0, %v1236_v42  ;;  %v969_v4 = vadd.f32 %v937_v52, %v868_v59  ;;  %v438_v44 = vmul.f32 %v1717_v41, %v1634_v37  ;;  %v1137_v34 = vmul.f32 %v1692_v1, %v1101_v25  ;;  %v1817_v3 = vld [vmem:[#allocation2 + $0x78] sm:$0xff] }
  0x51   : > { %v1237_v16 = vadd.f32 %v1205_v29, %v1496_v5  ;;  %v1037_v5 = vmul.f32 %v1687_v60, %v1001_v57  ;;  %v769_v48 = vadd.f32 %v737_v39, %v669_v63  ;;  %v837_v55 = vmul.f32 %v1100_v12, %v1677_v51  ;;  %v1003_v59 = vld [vmem:[#allocation2 + $0x79] sm:$0xff] }
  0x52   : > { %v1206_v53 = vadd.f32 %v1750_v27, %v1168_v35  ;;  %v938_v47 = vmul.f32 %v1682_v56, %v1789_v49  ;;  %v470_v0 = vadd.f32 %v438_v44, %v338_v36  ;;  %v538_v21 = vmul.f32 %v1726_v46, %v1637_v38  ;;  %v1828_v52 = vld [vmem:[#allocation2 + $0x7a] sm:$0xff] }
  0x53   : > { %1269 = vst.msk [vmem:[%s1768_s29 + $0x10] sm:$0xff] %vm203_vm0, %v1237_v16  ;;  %v1069_v2 = vadd.f32 %v1037_v5, %v969_v4  ;;  %v869_v40 = vadd.f32 %v837_v55, %v769_v48  ;;  %v1038_v28 = vmul.f32 %v1687_v60, %v1798_v26  ;;  %v339_v29 = vmul.f32 %v1738_v30, %v1617_v33 }
  0x54   : > { %v1238_v41 = vadd.f32 %v1206_v53, %v1505_v6  ;;  %v570_v20 = vadd.f32 %v538_v21, %v470_v0  ;;  %v638_v31 = vmul.f32 %v901_v32, %v1667_v45  ;;  %v439_v61 = vmul.f32 %v1740_v43, %v1634_v37  ;;  %v1847_v21 = vld [vmem:[#allocation2 + $0x82] sm:$0xff] }
  0x55   : > { %v1169_v58 = vadd.f32 %v1137_v34, %v1069_v2  ;;  %v970_v46 = vadd.f32 %v938_v47, %v869_v40  ;;  %v1138_v6 = vmul.f32 %v1692_v1, %v1807_v54  ;;  %v738_v62 = vmul.f32 %v1001_v57, %v1674_v50  ;;  %v1837_v34 = vld [vmem:[#allocation2 + $0x80] sm:$0xff] }
  0x56   : > { %1270 = vst.msk [vmem:[%s1768_s29 + $0x18] sm:$0xff] %vm203_vm0, %v1238_v41  ;;  %v838_v42 = vmul.f32 %v1101_v25, %v1677_v51  ;;  %v670_v16 = vadd.f32 %v638_v31, %v570_v20  ;;  %v471_v35 = vadd.f32 %v439_v61, %v339_v29  ;;  %v539_v43 = vmul.f32 %v1100_v12, %v1637_v38 }
  0x57   : > { %v1207_v30 = vadd.f32 %v1750_v27, %v1169_v58  ;;  %v1070_v63 = vadd.f32 %v1038_v28, %v970_v46  ;;  %v939_v39 = vmul.f32 %v1682_v56, %v1817_v3  ;;  %v639_v36 = vmul.f32 %v1789_v49, %v1667_v45  ;;  %v1857_v46 = vld [vmem:[#allocation2 + $0x90] sm:$0xff] }
  0x58   : > { %v340_v4 = vmul.f32 %v901_v32, %v1617_v33  ;;  %v770_v44 = vadd.f32 %v738_v62, %v670_v16  ;;  %v571_v53 = vadd.f32 %v539_v43, %v471_v35  ;;  %v440_v48 = vmul.f32 %v1001_v57, %v1634_v37 }
  0x59   : > { %v1239_v5 = vadd.f32 %v1207_v30, %v1508_v7  ;;  %v1170_v55 = vadd.f32 %v1138_v6, %v1070_v63  ;;  %v1039_v12 = vmul.f32 %v1687_v60, %v1003_v59  ;;  %v1139_v2 = vmul.f32 %v1692_v1, %v1828_v52  ;;  %v1004_v7 = vld [vmem:[#allocation2 + $0x81] sm:$0xff]  ;;  %v1865_v30 = vld [vmem:[#allocation2 + $0x91] sm:$0xff] }
  0x5a   : > { %v739_v47 = vmul.f32 %v1798_v26, %v1674_v50  ;;  %v870_v32 = vadd.f32 %v838_v42, %v770_v44  ;;  %v671_v0 = vadd.f32 %v639_v36, %v571_v53  ;;  %v472_v41 = vadd.f32 %v440_v48, %v340_v4  ;;  %v1876_v36 = vld [vmem:[#allocation2 + $0x92] sm:$0xff] }
  0x5b   : > { %1271 = vst.msk [vmem:[%s1768_s29 + $0x20] sm:$0xff] %vm203_vm0, %v1239_v5  ;;  %v540_v40 = vmul.f32 %v1101_v25, %v1637_v38  ;;  %v1208_v57 = vadd.f32 %v1750_v27, %v1170_v55  ;;  %v839_v28 = vmul.f32 %v1807_v54, %v1677_v51  ;;  %v940_v29 = vmul.f32 %v1682_v56, %v1837_v34 }
  0x5c   : > { %v640_v58 = vmul.f32 %v1817_v3, %v1667_v45  ;;  %v971_v20 = vadd.f32 %v939_v39, %v870_v32  ;;  %v771_v31 = vadd.f32 %v739_v47, %v671_v0  ;;  %v341_v25 = vmul.f32 %v1789_v49, %v1617_v33 }
  0x5d   : > { %v572_v61 = vadd.f32 %v540_v40, %v472_v41  ;;  %v1240_v6 = vadd.f32 %v1208_v57, %v1511_v8  ;;  %v1040_v62 = vmul.f32 %v1687_v60, %v1004_v7  ;;  %v1140_v42 = vmul.f32 %v1692_v1, %v1847_v21 }
  0x5e   : > { %v441_v16 = vmul.f32 %v1798_v26, %v1634_v37  ;;  %v1071_v35 = vadd.f32 %v1039_v12, %v971_v20  ;;  %v871_v43 = vadd.f32 %v839_v28, %v771_v31  ;;  %v740_v39 = vmul.f32 %v1003_v59, %v1674_v50 }
  0x5f   : > { %v672_v63 = vadd.f32 %v640_v58, %v572_v61  ;;  %1272 = vst.msk [vmem:[%s1768_s29 + $0x28] sm:$0xff] %vm203_vm0, %v1240_v6  ;;  %v840_v8 = vmul.f32 %v1828_v52, %v1677_v51  ;;  %v941_v49 = vmul.f32 %v1682_v56, %v1857_v46  ;;  %v541_v5 = vmul.f32 %v1807_v54, %v1637_v38  ;;  %v1006_v61 = vld [vmem:[#allocation2 + $0x99] sm:$0xff] }
  0x60   : > { %v473_v4 = vadd.f32 %v441_v16, %v341_v25  ;;  %v1171_v26 = vadd.f32 %v1139_v2, %v1071_v35  ;;  %v972_v44 = vadd.f32 %v940_v29, %v871_v43  ;;  %v1041_v48 = vmul.f32 %v1687_v60, %v1865_v30  ;;  %v1890_v2 = vld [vmem:[#allocation2 + $0x98] sm:$0xff] }
  0x61   : > { %v772_v53 = vadd.f32 %v740_v39, %v672_v63  ;;  %v641_v12 = vmul.f32 %v1837_v34, %v1667_v45  ;;  %v342_v47 = vmul.f32 %v1817_v3, %v1617_v33  ;;  %v442_v32 = vmul.f32 %v1003_v59, %v1634_v37 }
  0x62   : > { %v573_v55 = vadd.f32 %v541_v5, %v473_v4  ;;  %v1209_v0 = vadd.f32 %v1750_v27, %v1171_v26  ;;  %v1072_v41 = vadd.f32 %v1040_v62, %v972_v44  ;;  %v1141_v54 = vmul.f32 %v1692_v1, %v1876_v36  ;;  %v1911_v4 = vld [vmem:[#allocation2 + $0xa8] sm:$0xff] }
  0x63   : > { %v872_v40 = vadd.f32 %v840_v8, %v772_v53  ;;  %v741_v28 = vmul.f32 %v1004_v7, %v1674_v50  ;;  %v474_v29 = vadd.f32 %v442_v32, %v342_v47  ;;  %v542_v58 = vmul.f32 %v1828_v52, %v1637_v38 }
  0x64   : > { %v673_v57 = vadd.f32 %v641_v12, %v573_v55  ;;  %v1241_v3 = vadd.f32 %v1209_v0, %v1520_v9  ;;  %v1172_v59 = vadd.f32 %v1140_v42, %v1072_v41  ;;  %v841_v31 = vmul.f32 %v1847_v21, %v1677_v51  ;;  %v1106_v9 = vld [vmem:[#allocation2 + $0x9a] sm:$0xff]  ;;  %v1007_v12 = vld [vmem:[#allocation2 + $0xa9] sm:$0xff] }
  0x65   : > { %v973_v20 = vadd.f32 %v941_v49, %v872_v40  ;;  %v942_v6 = vmul.f32 %v1682_v56, %v1890_v2  ;;  %v574_v62 = vadd.f32 %v542_v58, %v474_v29  ;;  %v642_v16 = vmul.f32 %v1857_v46, %v1667_v45  ;;  %v1107_v40 = vld [vmem:[#allocation2 + $0xaa] sm:$0xff] }
  0x66   : > { %v773_v25 = vadd.f32 %v741_v28, %v673_v57  ;;  %1273 = vst.msk [vmem:[%s1768_s29 + $0x30] sm:$0xff] %vm203_vm0, %v1241_v3  ;;  %v1210_v52 = vadd.f32 %v1750_v27, %v1172_v59  ;;  %v343_v42 = vmul.f32 %v1837_v34, %v1617_v33  ;;  %v443_v43 = vmul.f32 %v1004_v7, %v1634_v37 }
  0x67   : > { %v1073_v35 = vadd.f32 %v1041_v48, %v973_v20  ;;  %v1042_v39 = vmul.f32 %v1687_v60, %v1006_v61  ;;  %v674_v8 = vadd.f32 %v642_v16, %v574_v62  ;;  %v742_v49 = vmul.f32 %v1865_v30, %v1674_v50 }
  0x68   : > { %v873_v63 = vadd.f32 %v841_v31, %v773_v25  ;;  %v1242_v5 = vadd.f32 %v1210_v52, %v1523_v10  ;;  %v475_v44 = vadd.f32 %v443_v43, %v343_v42  ;;  %v543_v53 = vmul.f32 %v1847_v21, %v1637_v38  ;;  %v1008_v25 = vld [vmem:[#allocation2 + $0xb1] sm:$0xff] }
  0x69   : > { %v1173_v26 = vadd.f32 %v1141_v54, %v1073_v35  ;;  %v1142_v48 = vmul.f32 %v1692_v1, %v1106_v9  ;;  %v774_v7 = vadd.f32 %v742_v49, %v674_v8  ;;  %v842_v55 = vmul.f32 %v1876_v36, %v1677_v51  ;;  %v1926_v54 = vld [vmem:[#allocation2 + $0xb0] sm:$0xff]  ;;  %v1947_v8 = vld [vmem:[#allocation2 + $0xc0] sm:$0xff] }
  0x6a   : > { %v974_v34 = vadd.f32 %v942_v6, %v873_v63  ;;  %1274 = vst.msk [vmem:[%s1768_s29 + $0x38] sm:$0xff] %vm203_vm0, %v1242_v5  ;;  %v943_v10 = vmul.f32 %v1682_v56, %v1911_v4  ;;  %v575_v32 = vadd.f32 %v543_v53, %v475_v44  ;;  %v643_v0 = vmul.f32 %v1890_v2, %v1667_v45  ;;  %v1108_v42 = vld [vmem:[#allocation2 + $0xb2] sm:$0xff] }
  0x6b   : > { %v1211_v47 = vadd.f32 %v1750_v27, %v1173_v26  ;;  %v874_v41 = vadd.f32 %v842_v55, %v774_v7  ;;  %v344_v57 = vmul.f32 %v1857_v46, %v1617_v33  ;;  %v444_v28 = vmul.f32 %v1865_v30, %v1634_v37  ;;  %v1009_v55 = vld [vmem:[#allocation2 + $0xc1] sm:$0xff] }
  0x6c   : > { %v1074_v21 = vadd.f32 %v1042_v39, %v974_v34  ;;  %v1043_v58 = vmul.f32 %v1687_v60, %v1007_v12  ;;  %v675_v3 = vadd.f32 %v643_v0, %v575_v32  ;;  %v743_v59 = vmul.f32 %v1006_v61, %v1674_v50  ;;  %v1109_v0 = vld [vmem:[#allocation2 + $0xc2] sm:$0xff] }
  0x6d   : > { %v1243_v29 = vadd.f32 %v1211_v47, %v1526_v11  ;;  %v975_v31 = vadd.f32 %v943_v10, %v874_v41  ;;  %v476_v6 = vadd.f32 %v444_v28, %v344_v57  ;;  %v544_v62 = vmul.f32 %v1876_v36, %v1637_v38 }
  0x6e   : > { %v1174_v20 = vadd.f32 %v1142_v48, %v1074_v21  ;;  %v1143_v46 = vmul.f32 %v1692_v1, %v1107_v40  ;;  %v775_v16 = vadd.f32 %v743_v59, %v675_v3  ;;  %v843_v30 = vmul.f32 %v1106_v9, %v1677_v51  ;;  %v1968_v3 = vld [vmem:[#allocation2 + $0xc8] sm:$0xff] }
  0x6f   : > { %1275 = vst.msk [vmem:[%s1768_s29 + $0x40] sm:$0xff] %vm203_vm0, %v1243_v29  ;;  %v944_v11 = vmul.f32 %v1682_v56, %v1926_v54  ;;  %v1075_v35 = vadd.f32 %v1043_v58, %v975_v31  ;;  %v576_v43 = vadd.f32 %v544_v62, %v476_v6  ;;  %v644_v63 = vmul.f32 %v1911_v4, %v1667_v45 }
  0x70   : > { %v1212_v52 = vadd.f32 %v1750_v27, %v1174_v20  ;;  %v875_v36 = vadd.f32 %v843_v30, %v775_v16  ;;  %v1044_v39 = vmul.f32 %v1687_v60, %v1008_v25  ;;  %v345_v49 = vmul.f32 %v1890_v2, %v1617_v33  ;;  %v1010_v16 = vld [vmem:[#allocation2 + $0xc9] sm:$0xff] }
  0x71   : > { %v445_v5 = vmul.f32 %v1006_v61, %v1634_v37  ;;  %v1175_v44 = vadd.f32 %v1143_v46, %v1075_v35  ;;  %v676_v53 = vadd.f32 %v644_v63, %v576_v43  ;;  %v744_v34 = vmul.f32 %v1007_v12, %v1674_v50  ;;  %v1110_v63 = vld [vmem:[#allocation2 + $0xca] sm:$0xff] }
  0x72   : > { %v1244_v26 = vadd.f32 %v1212_v52, %v1538_v13  ;;  %v976_v48 = vadd.f32 %v944_v11, %v875_v36  ;;  %v1144_v7 = vmul.f32 %v1692_v1, %v1108_v42  ;;  %v545_v10 = vmul.f32 %v1106_v9, %v1637_v38 }
  0x73   : > { %v477_v47 = vadd.f32 %v445_v5, %v345_v49  ;;  %v1213_v32 = vadd.f32 %v1750_v27, %v1175_v44  ;;  %v776_v2 = vadd.f32 %v744_v34, %v676_v53  ;;  %v844_v61 = vmul.f32 %v1107_v40, %v1677_v51 }
  0x74   : > { %1276 = vst.msk [vmem:[%s1768_s29 + $0x48] sm:$0xff] %vm203_vm0, %v1244_v26  ;;  %v945_v13 = vmul.f32 %v1682_v56, %v1947_v8  ;;  %v1076_v21 = vadd.f32 %v1044_v39, %v976_v48  ;;  %v645_v57 = vmul.f32 %v1926_v54, %v1667_v45  ;;  %v346_v9 = vmul.f32 %v1911_v4, %v1617_v33  ;;  %v1982_v39 = vld [vmem:[#allocation2 + $0xd8] sm:$0xff] }
  0x75   : > { %v577_v41 = vadd.f32 %v545_v10, %v477_v47  ;;  %v1245_v28 = vadd.f32 %v1213_v32, %v1541_v14  ;;  %v876_v29 = vadd.f32 %v844_v61, %v776_v2  ;;  %v1045_v58 = vmul.f32 %v1687_v60, %v1009_v55 }
  0x76   : > { %v446_v59 = vmul.f32 %v1007_v12, %v1634_v37  ;;  %v1176_v20 = vadd.f32 %v1144_v7, %v1076_v21  ;;  %v1145_v31 = vmul.f32 %v1692_v1, %v1109_v0  ;;  %v745_v62 = vmul.f32 %v1008_v25, %v1674_v50  ;;  %v1990_v7 = vld [vmem:[#allocation2 + $0xd9] sm:$0xff] }
  0x77   : > { %v677_v6 = vadd.f32 %v645_v57, %v577_v41  ;;  %1277 = vst.msk [vmem:[%s1768_s29 + $0x50] sm:$0xff] %vm203_vm0, %v1245_v28  ;;  %v977_v46 = vadd.f32 %v945_v13, %v876_v29  ;;  %v845_v4 = vmul.f32 %v1108_v42, %v1677_v51  ;;  %v546_v30 = vmul.f32 %v1107_v40, %v1637_v38  ;;  %v2000_v13 = vld [vmem:[#allocation2 + $0xda] sm:$0xff] }
  0x78   : > { %v478_v14 = vadd.f32 %v446_v59, %v346_v9  ;;  %v1214_v11 = vadd.f32 %v1750_v27, %v1176_v20  ;;  %v946_v12 = vmul.f32 %v1682_v56, %v1968_v3  ;;  %v646_v35 = vmul.f32 %v1947_v8, %v1667_v45  ;;  %v2006_v9 = vld [vmem:[#allocation2 + $0xe0] sm:$0xff] }
  0x79   : > { %v777_v52 = vadd.f32 %v745_v62, %v677_v6  ;;  %v1077_v43 = vadd.f32 %v1045_v58, %v977_v46  ;;  %v347_v49 = vmul.f32 %v1926_v54, %v1617_v33  ;;  %v447_v40 = vmul.f32 %v1008_v25, %v1634_v37  ;;  %v1012_v46 = vld [vmem:[#allocation2 + $0xe1] sm:$0xff] }
  0x7a   : > { %v578_v36 = vadd.f32 %v546_v30, %v478_v14  ;;  %v1246_v5 = vadd.f32 %v1214_v11, %v1544_v15  ;;  %v1046_v44 = vmul.f32 %v1687_v60, %v1010_v16  ;;  %v746_v53 = vmul.f32 %v1009_v55, %v1674_v50  ;;  %v1112_v11 = vld [vmem:[#allocation2 + $0xe2] sm:$0xff] }
  0x7b   : > { %v877_v26 = vadd.f32 %v845_v4, %v777_v52  ;;  %v1177_v34 = vadd.f32 %v1145_v31, %v1077_v43  ;;  %v479_v47 = vadd.f32 %v447_v40, %v347_v49  ;;  %v547_v10 = vmul.f32 %v1108_v42, %v1637_v38  ;;  %v2027_v40 = vld [vmem:[#allocation2 + $0xf0] sm:$0xff] }
  0x7c   : > { %v678_v48 = vadd.f32 %v646_v35, %v578_v36  ;;  %1278 = vst.msk [vmem:[%s1768_s29 + $0x58] sm:$0xff] %vm203_vm0, %v1246_v5  ;;  %v1146_v54 = vmul.f32 %v1692_v1, %v1110_v63  ;;  %v846_v25 = vmul.f32 %v1109_v0, %v1677_v51  ;;  %v947_v15 = vmul.f32 %v1682_v56, %v1982_v39 }
  0x7d   : > { %v978_v32 = vadd.f32 %v946_v12, %v877_v26  ;;  %v1215_v2 = vadd.f32 %v1750_v27, %v1177_v34  ;;  %v579_v21 = vadd.f32 %v547_v10, %v479_v47  ;;  %v647_v42 = vmul.f32 %v1968_v3, %v1667_v45  ;;  %v2034_v10 = vld [vmem:[#allocation2 + $0xf2] sm:$0xff] }
  0x7e   : > { %v778_v61 = vadd.f32 %v746_v53, %v678_v48  ;;  %v1047_v57 = vmul.f32 %v1687_v60, %v1990_v7  ;;  %v348_v28 = vmul.f32 %v1947_v8, %v1617_v33  ;;  %v448_v29 = vmul.f32 %v1009_v55, %v1634_v37 }
  0x7f   : > { %v1078_v41 = vadd.f32 %v1046_v44, %v978_v32  ;;  %v1247_v58 = vadd.f32 %v1215_v2, %v1555_v17  ;;  %v679_v20 = vadd.f32 %v647_v42, %v579_v21  ;;  %v747_v31 = vmul.f32 %v1010_v16, %v1674_v50 }
  0x80   : > { %v878_v59 = vadd.f32 %v846_v25, %v778_v61  ;;  %v1147_v62 = vmul.f32 %v1692_v1, %v2000_v13  ;;  %v480_v4 = vadd.f32 %v448_v29, %v348_v28  ;;  %v548_v14 = vmul.f32 %v1109_v0, %v1637_v38  ;;  %v2051_v28 = vld [vmem:[#allocation2 + $0xf8] sm:$0xff] }
  0x81   : > { %v1178_v6 = vadd.f32 %v1146_v54, %v1078_v41  ;;  %1279 = vst.msk [vmem:[%s1768_s29 + $0x60] sm:$0xff] %vm203_vm0, %v1247_v58  ;;  %v779_v8 = vadd.f32 %v747_v31, %v679_v20  ;;  %v847_v55 = vmul.f32 %v1110_v63, %v1677_v51  ;;  %v948_v17 = vmul.f32 %v1682_v56, %v2006_v9 }
  0x82   : > { %v979_v30 = vadd.f32 %v947_v15, %v878_v59  ;;  %v580_v12 = vadd.f32 %v548_v14, %v480_v4  ;;  %v648_v35 = vmul.f32 %v1982_v39, %v1667_v45  ;;  %v349_v43 = vmul.f32 %v1968_v3, %v1617_v33  ;;  %v1013_v3 = vld [vmem:[#allocation2 + $0xf1] sm:$0xff] }
  0x83   : > { %v1216_v52 = vadd.f32 %v1750_v27, %v1178_v6  ;;  %v879_v36 = vadd.f32 %v847_v55, %v779_v8  ;;  %v1048_v49 = vmul.f32 %v1687_v60, %v1012_v46  ;;  %v449_v5 = vmul.f32 %v1010_v16, %v1634_v37 }
  0x84   : > { %v1079_v0 = vadd.f32 %v1047_v57, %v979_v30  ;;  %v1148_v44 = vmul.f32 %v1692_v1, %v1112_v11  ;;  %v680_v53 = vadd.f32 %v648_v35, %v580_v12  ;;  %v748_v34 = vmul.f32 %v1990_v7, %v1674_v50  ;;  %v2067_v12 = vld [vmem:[#allocation2 + $0x108] sm:$0xff] }
  0x85   : > { %v1248_v26 = vadd.f32 %v1216_v52, %v1558_v18  ;;  %v980_v47 = vadd.f32 %v948_v17, %v879_v36  ;;  %v481_v32 = vadd.f32 %v449_v5, %v349_v43  ;;  %v549_v54 = vmul.f32 %v1110_v63, %v1637_v38  ;;  %v1114_v17 = vld [vmem:[#allocation2 + $0xfa] sm:$0xff] }
  0x86   : > { %v1179_v48 = vadd.f32 %v1147_v62, %v1079_v0  ;;  %v780_v25 = vadd.f32 %v748_v34, %v680_v53  ;;  %v848_v18 = vmul.f32 %v2000_v13, %v1677_v51  ;;  %v949_v16 = vmul.f32 %v1682_v56, %v2027_v40  ;;  %v1014_v62 = vld [vmem:[#allocation2 + $0xf9] sm:$0xff] }
  0x87   : > { %1280 = vst.msk [vmem:[%s1768_s29 + $0x68] sm:$0xff] %vm203_vm0, %v1248_v26  ;;  %v649_v15 = vmul.f32 %v2006_v9, %v1667_v45  ;;  %v1080_v61 = vadd.f32 %v1048_v49, %v980_v47  ;;  %v581_v21 = vadd.f32 %v549_v54, %v481_v32  ;;  %v350_v63 = vmul.f32 %v1982_v39, %v1617_v33  ;;  %v2086_v54 = vld [vmem:[#allocation2 + $0x10a] sm:$0xff] }
  0x88   : > { %v1217_v2 = vadd.f32 %v1750_v27, %v1179_v48  ;;  %v880_v42 = vadd.f32 %v848_v18, %v780_v25  ;;  %v1049_v41 = vmul.f32 %v1687_v60, %v1013_v3  ;;  %v1149_v57 = vmul.f32 %v1692_v1, %v2034_v10 }
  0x89   : > { %v450_v29 = vmul.f32 %v1990_v7, %v1634_v37  ;;  %v1180_v59 = vadd.f32 %v1148_v44, %v1080_v61  ;;  %v681_v20 = vadd.f32 %v649_v15, %v581_v21  ;;  %v749_v31 = vmul.f32 %v1012_v46, %v1674_v50  ;;  %v2075_v44 = vld [vmem:[#allocation2 + $0x109] sm:$0xff] }
  0x8a   : > { %v1249_v58 = vadd.f32 %v1217_v2, %v1561_v19  ;;  %v981_v6 = vadd.f32 %v949_v16, %v880_v42  ;;  %v849_v39 = vmul.f32 %v1112_v11, %v1677_v51  ;;  %v550_v14 = vmul.f32 %v2000_v13, %v1637_v38  ;;  %v2092_v15 = vld [vmem:[#allocation2 + $0x110] sm:$0xff] }
  0x8b   : > { %v482_v4 = vadd.f32 %v450_v29, %v350_v63  ;;  %v1218_v30 = vadd.f32 %v1750_v27, %v1180_v59  ;;  %v781_v8 = vadd.f32 %v749_v31, %v681_v20  ;;  %v950_v19 = vmul.f32 %v1682_v56, %v2051_v28 }
  0x8c   : > { %1281 = vst.msk [vmem:[%s1768_s29 + $0x70] sm:$0xff] %vm203_vm0, %v1249_v58  ;;  %v650_v7 = vmul.f32 %v2027_v40, %v1667_v45  ;;  %v1081_v55 = vadd.f32 %v1049_v41, %v981_v6  ;;  %v351_v13 = vmul.f32 %v2006_v9, %v1617_v33  ;;  %v451_v35 = vmul.f32 %v1012_v46, %v1634_v37  ;;  %v1016_v58 = vld [vmem:[#allocation2 + $0x111] sm:$0xff] }
  0x8d   : > { %v582_v52 = vadd.f32 %v550_v14, %v482_v4  ;;  %v1250_v43 = vadd.f32 %v1218_v30, %v1572_v22  ;;  %v881_v0 = vadd.f32 %v849_v39, %v781_v8  ;;  %v1050_v36 = vmul.f32 %v1687_v60, %v1014_v62  ;;  %v1116_v6 = vld [vmem:[#allocation2 + $0x112] sm:$0xff] }
  0x8e   : > { %v750_v49 = vmul.f32 %v1013_v3, %v1674_v50  ;;  %v1181_v5 = vadd.f32 %v1149_v57, %v1081_v55  ;;  %v483_v53 = vadd.f32 %v451_v35, %v351_v13  ;;  %v551_v34 = vmul.f32 %v1112_v11, %v1637_v38 }
  0x8f   : > { %v682_v26 = vadd.f32 %v650_v7, %v582_v52  ;;  %1282 = vst.msk [vmem:[%s1768_s29 + $0x78] sm:$0xff] %vm203_vm0, %v1250_v43  ;;  %v982_v48 = vadd.f32 %v950_v19, %v881_v0  ;;  %v1150_v9 = vmul.f32 %v1692_v1, %v1114_v17  ;;  %v850_v22 = vmul.f32 %v2034_v10, %v1677_v51  ;;  %v2114_v7 = vld [vmem:[#allocation2 + $0x120] sm:$0xff] }
  0x90   : > { %v951_v46 = vmul.f32 %v1682_v56, %v2067_v12  ;;  %v1219_v47 = vadd.f32 %v1750_v27, %v1181_v5  ;;  %v583_v25 = vadd.f32 %v551_v34, %v483_v53  ;;  %v651_v11 = vmul.f32 %v2051_v28, %v1667_v45 }
  0x91   : > { %v782_v32 = vadd.f32 %v750_v49, %v682_v26  ;;  %v1082_v18 = vadd.f32 %v1050_v36, %v982_v48  ;;  %v1051_v16 = vmul.f32 %v1687_v60, %v2075_v44  ;;  %v352_v2 = vmul.f32 %v2027_v40, %v1617_v33  ;;  %v2121_v49 = vld [vmem:[#allocation2 + $0x122] sm:$0xff] }
  0x92   : > { %v452_v61 = vmul.f32 %v1013_v3, %v1634_v37  ;;  %v1251_v21 = vadd.f32 %v1219_v47, %v1575_v23  ;;  %v683_v42 = vadd.f32 %v651_v11, %v583_v25  ;;  %v751_v41 = vmul.f32 %v1014_v62, %v1674_v50  ;;  %v2138_v25 = vld [vmem:[#allocation2 + $0x128] sm:$0xff] }
  0x93   : > { %v882_v63 = vadd.f32 %v850_v22, %v782_v32  ;;  %v1182_v57 = vadd.f32 %v1150_v9, %v1082_v18  ;;  %v1151_v29 = vmul.f32 %v1692_v1, %v2086_v54  ;;  %v552_v20 = vmul.f32 %v2034_v10, %v1637_v38  ;;  %v2395_v18 = vld [vmem:[#allocation3_spill] sm:$0xff] }
  0x94   : > { %v484_v59 = vadd.f32 %v452_v61, %v352_v2  ;;  %1283 = vst.msk [vmem:[%s1768_s29 + $0x80] sm:$0xff] %vm203_vm0, %v1251_v21  ;;  %v783_v31 = vadd.f32 %v751_v41, %v683_v42  ;;  %v851_v3 = vmul.f32 %v1114_v17, %v1677_v51  ;;  %v952_v23 = vmul.f32 %v1682_v56, %v2092_v15  ;;  %v1018_v42 = vld [vmem:[#allocation2 + $0x129] sm:$0xff] }
  0x95   : > { %v983_v40 = vadd.f32 %v951_v46, %v882_v63  ;;  %v1220_v39 = vadd.f32 %v1750_v27, %v1182_v57  ;;  %v652_v14 = vmul.f32 %v2067_v12, %v1667_v45  ;;  %v353_v30 = vmul.f32 %v2051_v28, %v1617_v33  ;;  %v1017_v28 = vld [vmem:[#allocation2 + $0x121] sm:$0xff] }
  0x96   : > { %v584_v4 = vadd.f32 %v552_v20, %v484_v59  ;;  %v883_v8 = vadd.f32 %v851_v3, %v783_v31  ;;  %v1052_v19 = vmul.f32 %v1687_v60, %v1016_v58  ;;  %v453_v55 = vmul.f32 %v1014_v62, %v1634_v37  ;;  %v1118_v31 = vld [vmem:[#allocation2 + $0x12a] sm:$0xff] }
  0x97   : > { %v1083_v10 = vadd.f32 %v1051_v16, %v983_v40  ;;  %v1252_v52 = vadd.f32 %v1220_v39, %v1578_v24  ;;  %v1152_v13 = vmul.f32 %v1692_v1, %v1116_v6  ;;  %v752_v43 = vmul.f32 %v2075_v44, %v1674_v50 }
  0x98   : > { %v684_v35 = vadd.f32 %v652_v14, %v584_v4  ;;  %v984_v36 = vadd.f32 %v952_v23, %v883_v8  ;;  %v485_v5 = vadd.f32 %v453_v55, %v353_v30  ;;  %v553_v26 = vmul.f32 %v1114_v17, %v1637_v38  ;;  %v2154_v23 = vld [vmem:[#allocation2 + $0x138] sm:$0xff] }
  0x99   : > { %v1183_v0 = vadd.f32 %v1151_v29, %v1083_v10  ;;  %1284 = vst.msk [vmem:[%s1768_s29 + $0x88] sm:$0xff] %vm203_vm0, %v1252_v52  ;;  %v852_v24 = vmul.f32 %v2086_v54, %v1677_v51  ;;  %v953_v62 = vmul.f32 %v1682_v56, %v2114_v7  ;;  %v653_v34 = vmul.f32 %v2092_v15, %v1667_v45  ;;  %v2396_v4 = vld [vmem:[#allocation4_spill] sm:$0xff] }
  0x9a   : > { %v784_v53 = vadd.f32 %v752_v43, %v684_v35  ;;  %v1084_v9 = vadd.f32 %v1052_v19, %v984_v36  ;;  %v585_v22 = vadd.f32 %v553_v26, %v485_v5  ;;  %v354_v17 = vmul.f32 %v2067_v12, %v1617_v33  ;;  %v2162_v52 = vld [vmem:[#allocation2 + $0x139] sm:$0xff] }
  0x9b   : > { %v1221_v48 = vadd.f32 %v1750_v27, %v1183_v0  ;;  %v1053_v47 = vmul.f32 %v1687_v60, %v1017_v28  ;;  %v1153_v32 = vmul.f32 %v1692_v1, %v2121_v49  ;;  %v454_v11 = vmul.f32 %v2075_v44, %v1634_v37  ;;  %v2173_v26 = vld [vmem:[#allocation2 + $0x13a] sm:$0xff] }
  0x9c   : > { %v884_v46 = vadd.f32 %v852_v24, %v784_v53  ;;  %v1184_v2 = vadd.f32 %v1152_v13, %v1084_v9  ;;  %v685_v61 = vadd.f32 %v653_v34, %v585_v22  ;;  %v753_v21 = vmul.f32 %v1016_v58, %v1674_v50  ;;  %v2179_v34 = vld [vmem:[#allocation2 + $0x140] sm:$0xff] }
  0x9d   : > { %v1253_v16 = vadd.f32 %v1221_v48, %v2395_v18  ;;  %v853_v12 = vmul.f32 %v1116_v6, %v1677_v51  ;;  %v486_v41 = vadd.f32 %v454_v11, %v354_v17  ;;  %v554_v57 = vmul.f32 %v2086_v54, %v1637_v38  ;;  %v2397_v22 = vld [vmem:[#allocation5_spill] sm:$0xff] }
  0x9e   : > { %v985_v63 = vadd.f32 %v953_v62, %v884_v46  ;;  %v1222_v29 = vadd.f32 %v1750_v27, %v1184_v2  ;;  %v785_v59 = vadd.f32 %v753_v21, %v685_v61  ;;  %v954_v44 = vmul.f32 %v1682_v56, %v2138_v25 }
  0x9f   : > { %1285 = vst.msk [vmem:[%s1768_s29 + $0x90] sm:$0xff] %vm203_vm0, %v1253_v16  ;;  %v654_v20 = vmul.f32 %v2114_v7, %v1667_v45  ;;  %v586_v3 = vadd.f32 %v554_v57, %v486_v41  ;;  %v355_v54 = vmul.f32 %v2092_v15, %v1617_v33  ;;  %v455_v39 = vmul.f32 %v1016_v58, %v1634_v37  ;;  %v1020_v16 = vld [vmem:[#allocation2 + $0x141] sm:$0xff] }
  0xa0   : > { %v1085_v40 = vadd.f32 %v1053_v47, %v985_v63  ;;  %v1254_v14 = vadd.f32 %v1222_v29, %v2396_v4  ;;  %v885_v30 = vadd.f32 %v853_v12, %v785_v59  ;;  %v1054_v10 = vmul.f32 %v1687_v60, %v1018_v42  ;;  %v2195_v12 = vld [vmem:[#allocation2 + $0x142] sm:$0xff] }
  0xa1   : > { %v754_v8 = vmul.f32 %v1017_v28, %v1674_v50  ;;  %v686_v55 = vadd.f32 %v654_v20, %v586_v3  ;;  %v487_v13 = vadd.f32 %v455_v39, %v355_v54  ;;  %v555_v35 = vmul.f32 %v1116_v6, %v1637_v38  ;;  %v2398_v54 = vld [vmem:[#allocation6_spill] sm:$0xff] }
  0xa2   : > { %v1185_v19 = vadd.f32 %v1153_v32, %v1085_v40  ;;  %1286 = vst.msk [vmem:[%s1768_s29 + $0x98] sm:$0xff] %vm203_vm0, %v1254_v14  ;;  %v986_v43 = vadd.f32 %v954_v44, %v885_v30  ;;  %v1154_v15 = vmul.f32 %v1692_v1, %v1118_v31  ;;  %v854_v58 = vmul.f32 %v2121_v49, %v1677_v51  ;;  %v2203_v40 = vld [vmem:[#allocation2 + $0x150] sm:$0xff] }
  0xa3   : > { %v955_v0 = vmul.f32 %v1682_v56, %v2154_v23  ;;  %v786_v5 = vadd.f32 %v754_v8, %v686_v55  ;;  %v587_v53 = vadd.f32 %v555_v35, %v487_v13  ;;  %v655_v6 = vmul.f32 %v2138_v25, %v1667_v45  ;;  %v1021_v8 = vld [vmem:[#allocation2 + $0x151] sm:$0xff] }
  0xa4   : > { %v1223_v36 = vadd.f32 %v1750_v27, %v1185_v19  ;;  %v1086_v24 = vadd.f32 %v1054_v10, %v986_v43  ;;  %v1055_v62 = vmul.f32 %v1687_v60, %v2162_v52  ;;  %v356_v48 = vmul.f32 %v2114_v7, %v1617_v33  ;;  %v2211_v19 = vld [vmem:[#allocation2 + $0x152] sm:$0xff] }
  0xa5   : > { %v456_v9 = vmul.f32 %v1017_v28, %v1634_v37  ;;  %v886_v46 = vadd.f32 %v854_v58, %v786_v5  ;;  %v687_v47 = vadd.f32 %v655_v6, %v587_v53  ;;  %v755_v32 = vmul.f32 %v1018_v42, %v1674_v50 }
  0xa6   : > { %v1255_v17 = vadd.f32 %v1223_v36, %v2397_v22  ;;  %v1186_v11 = vadd.f32 %v1154_v15, %v1086_v24  ;;  %v1155_v18 = vmul.f32 %v1692_v1, %v2173_v26  ;;  %v556_v61 = vmul.f32 %v2121_v49, %v1637_v38  ;;  %v2228_v24 = vld [vmem:[#allocation2 + $0x158] sm:$0xff] }
  0xa7   : > { %v488_v2 = vadd.f32 %v456_v9, %v356_v48  ;;  %v987_v7 = vadd.f32 %v955_v0, %v886_v46  ;;  %v787_v21 = vadd.f32 %v755_v32, %v687_v47  ;;  %v855_v28 = vmul.f32 %v1118_v31, %v1677_v51  ;;  %v2399_v48 = vld [vmem:[#allocation7_spill] sm:$0xff]  ;;  %v1022_v47 = vld [vmem:[#allocation2 + $0x159] sm:$0xff] }
  0xa8   : > { %1287 = vst.msk [vmem:[%s1768_s29 + $0xa0] sm:$0xff] %vm203_vm0, %v1255_v17  ;;  %v956_v63 = vmul.f32 %v1682_v56, %v2179_v34  ;;  %v1224_v41 = vadd.f32 %v1750_v27, %v1186_v11  ;;  %v656_v29 = vmul.f32 %v2154_v23, %v1667_v45  ;;  %v357_v49 = vmul.f32 %v2138_v25, %v1617_v33 }
  0xa9   : > { %v588_v57 = vadd.f32 %v556_v61, %v488_v2  ;;  %v1087_v59 = vadd.f32 %v1055_v62, %v987_v7  ;;  %v887_v44 = vadd.f32 %v855_v28, %v787_v21  ;;  %v1056_v20 = vmul.f32 %v1687_v60, %v1020_v16  ;;  %v1122_v28 = vld [vmem:[#allocation2 + $0x15a] sm:$0xff] }
  0xaa   : > { %v457_v3 = vmul.f32 %v1018_v42, %v1634_v37  ;;  %v1256_v39 = vadd.f32 %v1224_v41, %v2398_v54  ;;  %v1156_v4 = vmul.f32 %v1692_v1, %v2195_v12  ;;  %v756_v30 = vmul.f32 %v2162_v52, %v1674_v50 }
  0xab   : > { %v688_v14 = vadd.f32 %v656_v29, %v588_v57  ;;  %v1187_v10 = vadd.f32 %v1155_v18, %v1087_v59  ;;  %v988_v25 = vadd.f32 %v956_v63, %v887_v44  ;;  %v557_v13 = vmul.f32 %v1118_v31, %v1637_v38  ;;  %v2250_v63 = vld [vmem:[#allocation2 + $0x168] sm:$0xff]  ;;  %v2400_v29 = vld [vmem:[#allocation8_spill] sm:$0xff] }
  0xac   : > { %v489_v55 = vadd.f32 %v457_v3, %v357_v49  ;;  %1288 = vst.msk [vmem:[%s1768_s29 + $0xa8] sm:$0xff] %vm203_vm0, %v1256_v39  ;;  %v856_v35 = vmul.f32 %v2173_v26, %v1677_v51  ;;  %v957_v43 = vmul.f32 %v1682_v56, %v2203_v40  ;;  %v657_v15 = vmul.f32 %v2179_v34, %v1667_v45  ;;  %v2258_v39 = vld [vmem:[#allocation2 + $0x169] sm:$0xff] }
  0xad   : > { %v788_v42 = vadd.f32 %v756_v30, %v688_v14  ;;  %v1225_v58 = vadd.f32 %v1750_v27, %v1187_v10  ;;  %v1088_v0 = vadd.f32 %v1056_v20, %v988_v25  ;;  %v358_v31 = vmul.f32 %v2154_v23, %v1617_v33 }
  0xae   : > { %v589_v36 = vadd.f32 %v557_v13, %v489_v55  ;;  %v1057_v53 = vmul.f32 %v1687_v60, %v1021_v8  ;;  %v1157_v6 = vmul.f32 %v1692_v1, %v2211_v19  ;;  %v458_v62 = vmul.f32 %v2162_v52, %v1634_v37  ;;  %v2243_v52 = vld [vmem:[%s2364_s2] ss:$0 sm:$0xff]  ;;  %v1123_v13 = vld [vmem:[#allocation2 + $0x16a] sm:$0xff] }
  0xaf   : > { %v888_v5 = vadd.f32 %v856_v35, %v788_v42  ;;  %v1257_v9 = vadd.f32 %v1225_v58, %v2399_v48  ;;  %v1188_v27 = vadd.f32 %v1156_v4, %v1088_v0  ;;  %v757_v17 = vmul.f32 %v1020_v16, %v1674_v50 }
  0xb0   : > { %v689_v22 = vadd.f32 %v657_v15, %v589_v36  ;;  %v857_v23 = vmul.f32 %v2195_v12, %v1677_v51  ;;  %v490_v32 = vadd.f32 %v458_v62, %v358_v31  ;;  %v558_v11 = vmul.f32 %v2173_v26, %v1637_v38  ;;  %v2274_v15 = vld [vmem:[#allocation2 + $0x170] sm:$0xff]  ;;  %v2401_v36 = vld [vmem:[#allocation9_spill] sm:$0xff] }
  0xb1   : > { %v989_v46 = vadd.f32 %v957_v43, %v888_v5  ;;  %1289 = vst.msk [vmem:[%s1768_s29 + $0xb0] sm:$0xff] %vm203_vm0, %v1257_v9  ;;  %v1226_v18 = vadd.f32 %v2243_v52, %v1188_v27  ;;  %v958_v61 = vmul.f32 %v1682_v56, %v2228_v24  ;;  %v658_v7 = vmul.f32 %v2203_v40, %v1667_v45  ;;  %v1024_v9 = vld [vmem:[#allocation2 + $0x171] sm:$0xff] }
  0xb2   : > { %v789_v2 = vadd.f32 %v757_v17, %v689_v22  ;;  %v590_v26 = vadd.f32 %v558_v11, %v490_v32  ;;  %v359_v41 = vmul.f32 %v2179_v34, %v1617_v33  ;;  %v459_v57 = vmul.f32 %v1020_v16, %v1634_v37 }
  0xb3   : > { %v1089_v21 = vadd.f32 %v1057_v53, %v989_v46  ;;  %v1258_v49 = vadd.f32 %v1226_v18, %v2400_v29  ;;  %v1058_v44 = vmul.f32 %v1687_v60, %v1022_v47  ;;  %v758_v20 = vmul.f32 %v1021_v8, %v1674_v50 }
  0xb4   : > { %v889_v59 = vadd.f32 %v857_v23, %v789_v2  ;;  %v690_v54 = vadd.f32 %v658_v7, %v590_v26  ;;  %v491_v4 = vadd.f32 %v459_v57, %v359_v41  ;;  %v559_v14 = vmul.f32 %v2195_v12, %v1637_v38  ;;  %v1124_v23 = vld [vmem:[#allocation2 + $0x172] sm:$0xff]  ;;  %v2402_v41 = vld [vmem:[#allocation10_spill] sm:$0xff] }
  0xb5   : > { %v1189_v3 = vadd.f32 %v1157_v6, %v1089_v21  ;;  %1290 = vst.msk [vmem:[%s1768_s29 + $0xb8] sm:$0xff] %vm203_vm0, %v1258_v49  ;;  %v1158_v16 = vmul.f32 %v1692_v1, %v1122_v28  ;;  %v858_v30 = vmul.f32 %v2211_v19, %v1677_v51  ;;  %v959_v10 = vmul.f32 %v1682_v56, %v2250_v63  ;;  %v925_v21 = vld [vmem:[#allocation2 + $0x180] sm:$0xff] }
  0xb6   : > { %v990_v34 = vadd.f32 %v958_v61, %v889_v59  ;;  %v790_v55 = vadd.f32 %v758_v20, %v690_v54  ;;  %v591_v42 = vadd.f32 %v559_v14, %v491_v4  ;;  %v659_v12 = vmul.f32 %v2228_v24, %v1667_v45 }
  0xb7   : > { %v1227_v25 = vadd.f32 %v2243_v52, %v1189_v3  ;;  %v1059_v43 = vmul.f32 %v1687_v60, %v2258_v39  ;;  %v360_v58 = vmul.f32 %v2203_v40, %v1617_v33  ;;  %v460_v0 = vmul.f32 %v1021_v8, %v1634_v37  ;;  %v1025_v3 = vld [vmem:[#allocation2 + $0x181] sm:$0xff] }
  0xb8   : > { %v1090_v35 = vadd.f32 %v1058_v44, %v990_v34  ;;  %v890_v5 = vadd.f32 %v858_v30, %v790_v55  ;;  %v691_v53 = vadd.f32 %v659_v12, %v591_v42  ;;  %v759_v6 = vmul.f32 %v1022_v47, %v1674_v50 }
  0xb9   : > { %v1259_v31 = vadd.f32 %v1227_v25, %v2401_v36  ;;  %v1159_v48 = vmul.f32 %v1692_v1, %v1123_v13  ;;  %v492_v27 = vadd.f32 %v460_v0, %v360_v58  ;;  %v560_v22 = vmul.f32 %v2211_v19, %v1637_v38  ;;  %v2403_v58 = vld [vmem:[#allocation11_spill] sm:$0xff] }
  0xba   : > { %v1190_v62 = vadd.f32 %v1158_v16, %v1090_v35  ;;  %v991_v17 = vadd.f32 %v959_v10, %v890_v5  ;;  %v791_v40 = vadd.f32 %v759_v6, %v691_v53  ;;  %v859_v8 = vmul.f32 %v1122_v28, %v1677_v51  ;;  %v926_v35 = vld [vmem:[#allocation2 + $0x188] sm:$0xff] }
  0xbb   : > { %1291 = vst.msk [vmem:[%s1768_s29 + $0xc0] sm:$0xff] %vm203_vm0, %v1259_v31  ;;  %v960_v46 = vmul.f32 %v1682_v56, %v2274_v15  ;;  %v592_v11 = vadd.f32 %v560_v22, %v492_v27  ;;  %v660_v18 = vmul.f32 %v2250_v63, %v1667_v45  ;;  %v361_v2 = vmul.f32 %v2228_v24, %v1617_v33  ;;  %v1125_v24 = vld [vmem:[#allocation2 + $0x182] sm:$0xff] }
  0xbc   : > { %v1228_v32 = vadd.f32 %v2243_v52, %v1190_v62  ;;  %v1091_v19 = vadd.f32 %v1059_v43, %v991_v17  ;;  %v891_v61 = vadd.f32 %v859_v8, %v791_v40  ;;  %v1060_v7 = vmul.f32 %v1687_v60, %v1024_v9  ;;  %v1026_v40 = vld [vmem:[#allocation2 + $0x189] sm:$0xff] }
  0xbd   : > { %v461_v26 = vmul.f32 %v1022_v47, %v1634_v37  ;;  %v1160_v29 = vmul.f32 %v1692_v1, %v1124_v23  ;;  %v692_v49 = vadd.f32 %v660_v18, %v592_v11  ;;  %v760_v59 = vmul.f32 %v2258_v39, %v1674_v50 }
  0xbe   : > { %v1260_v57 = vadd.f32 %v1228_v32, %v2402_v41  ;;  %v1191_v44 = vadd.f32 %v1159_v48, %v1091_v19  ;;  %v992_v20 = vadd.f32 %v960_v46, %v891_v61  ;;  %v561_v4 = vmul.f32 %v1122_v28, %v1637_v38  ;;  %v2404_v32 = vld [vmem:[#allocation12_spill] sm:$0xff] }
  0xbf   : > { %v493_v54 = vadd.f32 %v461_v26, %v361_v2  ;;  %v792_v14 = vadd.f32 %v760_v59, %v692_v49  ;;  %v860_v47 = vmul.f32 %v1123_v13, %v1677_v51  ;;  %v961_v34 = vmul.f32 %v1682_v56, %v925_v21  ;;  %v927_v19 = vld [vmem:[#allocation2 + $0x198] sm:$0xff] }
  0xc0   : > { %1292 = vst.msk [vmem:[%s1768_s29 + $0xc8] sm:$0xff] %vm203_vm0, %v1260_v57  ;;  %v661_v16 = vmul.f32 %v2274_v15, %v1667_v45  ;;  %v1229_v30 = vadd.f32 %v2243_v52, %v1191_v44  ;;  %v1092_v10 = vadd.f32 %v1060_v7, %v992_v20  ;;  %v362_v55 = vmul.f32 %v2250_v63, %v1617_v33  ;;  %v928_v20 = vld [vmem:[#allocation2 + $0x1a0] sm:$0xff] }
  0xc1   : > { %v593_v25 = vadd.f32 %v561_v4, %v493_v54  ;;  %v892_v42 = vadd.f32 %v860_v47, %v792_v14  ;;  %v1061_v28 = vmul.f32 %v1687_v60, %v1025_v3  ;;  %v1161_v12 = vmul.f32 %v1692_v1, %v1125_v24 }
  0xc2   : > { %v462_v43 = vmul.f32 %v2258_v39, %v1634_v37  ;;  %v1261_v0 = vadd.f32 %v1229_v30, %v2403_v58  ;;  %v1192_v36 = vadd.f32 %v1160_v29, %v1092_v10  ;;  %v761_v5 = vmul.f32 %v1024_v9, %v1674_v50  ;;  %v1128_v58 = vld [vmem:[#allocation2 + $0x1a2] sm:$0xff] }
  0xc3   : > { %v693_v31 = vadd.f32 %v661_v16, %v593_v25  ;;  %v993_v53 = vadd.f32 %v961_v34, %v892_v42  ;;  %v562_v62 = vmul.f32 %v1123_v13, %v1637_v38  ;;  %v662_v63 = vmul.f32 %v925_v21, %v1667_v45  ;;  %v1126_v21 = vld [vmem:[#allocation2 + $0x18a] sm:$0xff]  ;;  %v1127_v34 = vld [vmem:[#allocation2 + $0x19a] sm:$0xff] }
  0xc4   : > { %v494_v6 = vadd.f32 %v462_v43, %v362_v55  ;;  %1293 = vst.msk [vmem:[%s1768_s29 + $0xd0] sm:$0xff] %vm203_vm0, %v1261_v0  ;;  %v1230_v48 = vadd.f32 %v2243_v52, %v1192_v36  ;;  %v861_v22 = vmul.f32 %v1124_v23, %v1677_v51  ;;  %v962_v39 = vmul.f32 %v1682_v56, %v926_v35  ;;  %v1028_v42 = vld [vmem:[#allocation2 + $0x1a1] sm:$0xff] }
  0xc5   : > { %v793_v27 = vadd.f32 %v761_v5, %v693_v31  ;;  %v1093_v17 = vadd.f32 %v1061_v28, %v993_v53  ;;  %v363_v46 = vmul.f32 %v2274_v15, %v1617_v33  ;;  %v463_v13 = vmul.f32 %v1024_v9, %v1634_v37  ;;  %v2407_v53 = vld [vmem:[#allocation15_spill] sm:$0xff] }
  0xc6   : > { %v594_v8 = vadd.f32 %v562_v62, %v494_v6  ;;  %v1262_v11 = vadd.f32 %v1230_v48, %v2404_v32  ;;  %v762_v2 = vmul.f32 %v1025_v3, %v1674_v50  ;;  %v563_v61 = vmul.f32 %v1124_v23, %v1637_v38  ;;  %v1027_v38 = vld [vmem:[#allocation2 + $0x199] sm:$0xff] }
  0xc7   : > { %v893_v18 = vadd.f32 %v861_v22, %v793_v27  ;;  %v1193_v7 = vadd.f32 %v1161_v12, %v1093_v17  ;;  %v495_v41 = vadd.f32 %v463_v13, %v363_v46  ;;  %v663_v57 = vmul.f32 %v926_v35, %v1667_v45  ;;  %v2405_v45 = vld [vmem:[#allocation13_spill] sm:$0xff]  ;;  %v2406_v35 = vld [vmem:[#allocation14_spill] sm:$0xff]  ;;  %v2408_v48 = vld [vmem:[#allocation16_spill] sm:$0xff] }
  0xc8   : > { %v694_v26 = vadd.f32 %v662_v63, %v594_v8  ;;  %1294 = vst.msk [vmem:[%s1768_s29 + $0xd8] sm:$0xff] %vm203_vm0, %v1262_v11  ;;  %v1062_v33 = vmul.f32 %v1687_v60, %v1026_v40  ;;  %v862_v37 = vmul.f32 %v1125_v24, %v1677_v51  ;;  %v963_v49 = vmul.f32 %v1682_v56, %v927_v19 }
  0xc9   : > { %v994_v29 = vadd.f32 %v962_v39, %v893_v18  ;;  %v1231_v15 = vadd.f32 %v2243_v52, %v1193_v7  ;;  %v595_v23 = vadd.f32 %v563_v61, %v495_v41  ;;  %v1162_v44 = vmul.f32 %v1692_v1, %v1126_v21 }
  0xca   : > { %v794_v9 = vadd.f32 %v762_v2, %v694_v26  ;;  %v763_v14 = vmul.f32 %v1026_v40, %v1674_v50  ;;  %v1063_v24 = vmul.f32 %v1687_v60, %v1027_v38  ;;  %v863_v10 = vmul.f32 %v1126_v21, %v1677_v51 }
  0xcb   : > { %v1094_v59 = vadd.f32 %v1062_v33, %v994_v29  ;;  %v1263_v3 = vadd.f32 %v1231_v15, %v2405_v45  ;;  %v695_v4 = vadd.f32 %v663_v57, %v595_v23  ;;  %v964_v25 = vmul.f32 %v1682_v56, %v928_v20 }
  0xcc   : > { %v894_v54 = vadd.f32 %v862_v37, %v794_v9  ;;  %v1163_v50 = vmul.f32 %v1692_v1, %v1127_v34  ;;  %v1064_v31 = vmul.f32 %v1687_v60, %v1028_v42  ;;  %v1164_v5 = vmul.f32 %v1692_v1, %v1128_v58 }
  0xcd   : > { %v1194_v47 = vadd.f32 %v1162_v44, %v1094_v59  ;;  %1295 = vst.msk [vmem:[%s1768_s29 + $0xe0] sm:$0xff] %vm203_vm0, %v1263_v3  ;;  %v795_v30 = vadd.f32 %v763_v14, %v695_v4 }
  0xce   : > { %v995_v16 = vadd.f32 %v963_v49, %v894_v54 }
  0xcf   : > { %v1232_v55 = vadd.f32 %v2243_v52, %v1194_v47  ;;  %v895_v12 = vadd.f32 %v863_v10, %v795_v30 }
  0xd0   : > { %v1095_v28 = vadd.f32 %v1063_v24, %v995_v16 }
  0xd1   : > { %v1264_v43 = vadd.f32 %v1232_v55, %v2406_v35  ;;  %v996_v36 = vadd.f32 %v964_v25, %v895_v12 }
  0xd2   : > { %v1195_v0 = vadd.f32 %v1163_v50, %v1095_v28 }
  0xd3   : > { %1296 = vst.msk [vmem:[%s1768_s29 + $0xe8] sm:$0xff] %vm203_vm0, %v1264_v43  ;;  %v1096_v56 = vadd.f32 %v1064_v31, %v996_v36 }
  0xd4   : > { %v1233_v51 = vadd.f32 %v2243_v52, %v1195_v0 }
  0xd5   : > { %v1196_v62 = vadd.f32 %v1164_v5, %v1096_v56 }
  0xd6   : > { %v1265_v6 = vadd.f32 %v1233_v51, %v2407_v53 }
  0xd7   : > { %v1234_v63 = vadd.f32 %v2243_v52, %v1196_v62 }
  0xd8   : > { %1297 = vst.msk [vmem:[%s1768_s29 + $0xf0] sm:$0xff] %vm203_vm0, %v1265_v6 }
  0xd9   : > { %v1266_v27 = vadd.f32 %v1234_v63, %v2408_v48 }
  0xdb   : > { %1298 = vst.msk [vmem:[%s1768_s29 + $0xf8] sm:$0xff] %vm203_vm0, %v1266_v27 }
  0xdc PF: > { %s13_s12 = sadd.s32 1, %s1384_s12  }
  0xdd   : > { %p10_p4 = scmp.ge.s32.totalorder %s13_s12, 4  }
  0xdf   :  { %12 = sbr.rel (!%p10_p4) target bundleno = 1 (0x1), region = 64 }

</bundles_post_ra>
